<compile_context>
chip_gen: v7x
topology: tpu7x:2x2x1
jax: 0.10.0
libtpu: 0.0.40
codegen_flags: <defaults>
</compile_context>

<pallas_src>
import jax
import jax.numpy as jnp
from jax import lax
from jax.experimental import pallas as pl
from jax.experimental.pallas import tpu as pltpu


# ------------------------------ fused kernel ------------------------------- #

def _conv3net_kernel(x_ref,
                     wbe1_ref, wbo1_ref, bp1_ref, pe1_ref, po1_ref,
                     wbe2_ref, wbo2_ref, bp2_ref, pe2_ref, po2_ref,
                     wb3_ref, b3_ref, wfc1_ref, bfc1_ref, wclf_ref, bclf_ref,
                     out_ref,
                     a2_ref, a3_ref, c3_ref):
    f32 = jnp.float32

    def conv_relu_pool(in_ref, wbe, wbo, bp, pe, po, dst):
        # in_ref: (H, W*Cin); wbe/wbo: (3, W*Cin, ne*C) / (3, W*Cin, no*C)
        # dst (pooled output): (Hp, no*C)
        ho = pe.shape[1]          # conv output rows
        wp = dst.shape[1]         # pooled width * channels
        acc_e = jnp.zeros((ho, wbe.shape[2]), f32)
        acc_o = jnp.zeros((ho, wbo.shape[2]), f32)
        for di in range(3):       # 3 kernel rows -> 3 banded matmuls per half
            lhs = in_ref[di:di + ho, :]
            acc_e = acc_e + jnp.dot(lhs, wbe[di], preferred_element_type=f32)
            acc_o = acc_o + jnp.dot(lhs, wbo[di], preferred_element_type=f32)
        # horizontal 2x1 max (even vs odd output columns), then bias + ReLU
        cm = jnp.maximum(acc_e[:, 0:wp], acc_o)
        cm = jnp.maximum(cm + bp[...], 0.0)
        # vertical 2x1 max via exact 0/1 row-selection matmuls
        dst[...] = jnp.maximum(
            jnp.dot(pe[...], cm, preferred_element_type=f32),
            jnp.dot(po[...], cm, preferred_element_type=f32))

    # conv1 + ReLU + pool, conv2 + ReLU + pool
    conv_relu_pool(x_ref, wbe1_ref, wbo1_ref, bp1_ref, pe1_ref, po1_ref, a2_ref)
    conv_relu_pool(a2_ref, wbe2_ref, wbo2_ref, bp2_ref, pe2_ref, po2_ref, a3_ref)

    # conv3 + ReLU (no pool); output columns in natural (col, channel) order
    ho3 = c3_ref.shape[0]
    acc = jnp.zeros((ho3, wb3_ref.shape[2]), f32)
    for di in range(3):
        acc = acc + jnp.dot(a3_ref[di:di + ho3, :], wb3_ref[di],
                            preferred_element_type=f32)
    c3_ref[...] = jnp.maximum(acc + b3_ref[...], 0.0)

    # fc1 (+ReLU): contract the (ho3, wo3*C) activation row-by-row against the
    # pre-permuted (ho3, wo3*C, hidden) weight, then the classifier head.
    h = bfc1_ref[...]
    for i in range(ho3):
        h = h + jnp.dot(c3_ref[i:i + 1, :], wfc1_ref[i], preferred_element_type=f32)
    h = jnp.maximum(h, 0.0)
    out_ref[...] = (jnp.dot(h, wclf_ref[...], preferred_element_type=f32)
                    + bclf_ref[...])


# --------------------------- parameter preparation ------------------------- #

def build_kernel_params(params, *, input_dim):
    """One-time weight preparation (layout work done on weights, not per call):
    banded conv matrices (split into even/odd output columns for fused pooling),
    tiled bias rows, 0/1 pool row-selectors, and pre-permuted FC weights."""
    f32 = jnp.float32
    c1w, c1b = params["conv1_w"].astype(f32), params["conv1_b"].astype(f32)
    c2w, c2b = params["conv2_w"].astype(f32), params["conv2_b"].astype(f32)
    c3w, c3b = params["conv3_w"].astype(f32), params["conv3_b"].astype(f32)
    fc1w, fc1b = params["fc1_w"].astype(f32), params["fc1_b"].astype(f32)
    clfw, clfb = params["clf_w"].astype(f32), params["clf_b"].astype(f32)

    def banded(w, width):
        # w: torch layout (Cout, Cin, 3, 3)  ->  (3, width*Cin, Wo*Cout)
        cout, cin, kh, kw = w.shape
        wo = width - kw + 1
        wt = jnp.transpose(w, (2, 3, 1, 0))                     # (kh, kw, Cin, Cout)
        diff = jnp.arange(width)[:, None] - jnp.arange(wo)[None, :]
        valid = ((diff >= 0) & (diff < kw)).astype(f32)
        dj = jnp.clip(diff, 0, kw - 1)
        bands = []
        for di in range(kh):
            blk = wt[di][dj] * valid[:, :, None, None]          # (width, wo, Cin, Cout)
            bands.append(jnp.transpose(blk, (0, 2, 1, 3)).reshape(width * cin,
                                                                  wo * cout))
        return jnp.stack(bands), wo, cout

    def split_even_odd(band, wo, cout):
        kh, rows, _ = band.shape
        b4 = band.reshape(kh, rows, wo, cout)
        be = b4[:, :, 0::2, :].reshape(kh, rows, -1)
        bo = b4[:, :, 1::2, :].reshape(kh, rows, -1)
        return be, bo

    def pool_selectors(h_in):
        hp = h_in // 2
        cols = jnp.arange(h_in)[None, :]
        rows = jnp.arange(hp)[:, None]
        return ((cols == 2 * rows).astype(f32),
                (cols == 2 * rows + 1).astype(f32))

    # stage 1: conv1 + pool
    band1, wo1, cc1 = banded(c1w, input_dim)
    wbe1, wbo1 = split_even_odd(band1, wo1, cc1)
    pe1, po1 = pool_selectors(wo1)
    wp1 = wo1 // 2
    bp1 = jnp.tile(c1b, wp1).reshape(1, wp1 * cc1)

    # stage 2: conv2 + pool
    band2, wo2, cc2 = banded(c2w, wp1)
    wbe2, wbo2 = split_even_odd(band2, wo2, cc2)
    pe2, po2 = pool_selectors(wo2)
    wp2 = wo2 // 2
    bp2 = jnp.tile(c2b, wp2).reshape(1, wp2 * cc2)

    # stage 3: conv3 (no pool)
    band3, wo3, cc3 = banded(c3w, wp2)
    b3 = jnp.tile(c3b, wo3).reshape(1, wo3 * cc3)

    # fc1: permute columns once so it consumes the kernel's (row, col*chan)
    # flatten order instead of torch's channel-major NCHW flatten.
    ho3 = wp2 - 2
    hidden = fc1w.shape[0]
    assert fc1w.shape[1] == cc3 * ho3 * wo3
    wfc1 = jnp.transpose(fc1w.reshape(hidden, cc3, ho3, wo3),
                         (2, 3, 1, 0)).reshape(ho3, wo3 * cc3, hidden)

    return {
        "wbe1": wbe1, "wbo1": wbo1, "bp1": bp1, "pe1": pe1, "po1": po1,
        "wbe2": wbe2, "wbo2": wbo2, "bp2": bp2, "pe2": pe2, "po2": po2,
        "wb3": band3, "b3": b3,
        "wfc1": wfc1, "bfc1": fc1b.reshape(1, hidden),
        "wclf": jnp.transpose(clfw), "bclf": clfb.reshape(1, clfw.shape[0]),
    }


# -------------------------------- forward ---------------------------------- #

def conv3net_forward(kp, x_nchw):
    """Fused Conv3Net forward.  kp: prepared params, x: NCHW float32."""
    n, cin, h, w = x_nchw.shape
    # only wrapper-side layout plumbing: NCHW -> (N, H, W*Cin) row-major slabs
    x_rows = jnp.transpose(x_nchw, (0, 2, 3, 1)).reshape(n, h, w * cin)
    x_rows = x_rows.astype(jnp.float32)

    order = ("wbe1", "wbo1", "bp1", "pe1", "po1",
             "wbe2", "wbo2", "bp2", "pe2", "po2",
             "wb3", "b3", "wfc1", "bfc1", "wclf", "bclf")
    weights = [kp[k] for k in order]

    ho1, hp1 = kp["pe1"].shape[1], kp["pe1"].shape[0]
    ho2, hp2 = kp["pe2"].shape[1], kp["pe2"].shape[0]
    a2_cols = kp["wbo1"].shape[2]
    a3_cols = kp["wbo2"].shape[2]
    ho3, c3_cols = kp["wfc1"].shape[0], kp["wb3"].shape[2]
    hidden = kp["bfc1"].shape[1]
    n_out = kp["bclf"].shape[1]

    def _full(arr):
        zeros = (0,) * arr.ndim
        return pl.BlockSpec(arr.shape, lambda b: zeros)

    in_specs = [pl.BlockSpec((None, h, w * cin), lambda b: (b, 0, 0))]
    in_specs += [_full(a) for a in weights]
    out_specs = pl.BlockSpec((None, 1, n_out), lambda b: (b, 0, 0))

    # advisory cost estimate: real (tiny) FLOP / byte counts
    macs = (3 * ho1 * (w * cin) * (kp["wbe1"].shape[2] + kp["wbo1"].shape[2])
            + 2 * hp1 * ho1 * a2_cols
            + 3 * ho2 * a2_cols * (kp["wbe2"].shape[2] + kp["wbo2"].shape[2])
            + 2 * hp2 * ho2 * a3_cols
            + 3 * ho3 * a3_cols * c3_cols
            + ho3 * c3_cols * hidden + hidden * n_out)
    bytes_accessed = 4 * (x_rows.size + sum(a.size for a in weights) + n * n_out)

    out = pl.pallas_call(
        _conv3net_kernel,
        out_shape=jax.ShapeDtypeStruct((n, 1, n_out), jnp.float32),
        grid=(n,),
        in_specs=in_specs,
        out_specs=out_specs,
        scratch_shapes=[
            pltpu.VMEM((hp1, a2_cols), jnp.float32),   # pooled stage-1 activation
            pltpu.VMEM((hp2, a3_cols), jnp.float32),   # pooled stage-2 activation
            pltpu.VMEM((ho3, c3_cols), jnp.float32),   # conv3 output
        ],
        compiler_params=pltpu.CompilerParams(
            dimension_semantics=("parallel",)),        # megacore on v7x
        cost_estimate=pl.CostEstimate(flops=int(2 * n * macs), transcendentals=0,
                                      bytes_accessed=int(bytes_accessed)),
    )(x_rows, *weights)
    return out.reshape(n, n_out)


# --------------------------- reference & params ----------------------------- #

def conv3net_reference(params, x_nchw):
    """Pure-JAX reference (XLA convs/pools) used only to validate the kernel."""
    hp = lax.Precision.HIGHEST

    def conv(x, w, b):
        y = lax.conv_general_dilated(
            x, w, window_strides=(1, 1), padding="VALID",
            dimension_numbers=("NCHW", "OIHW", "NCHW"), precision=hp)
        return jnp.maximum(y + b[None, :, None, None], 0.0)

    def pool(x):
        return lax.reduce_window(x, -jnp.inf, lax.max,
                                 (1, 1, 2, 2), (1, 1, 2, 2), "VALID")

    x = pool(conv(x_nchw, params["conv1_w"], params["conv1_b"]))
    x = pool(conv(x, params["conv2_w"], params["conv2_b"]))
    x = conv(x, params["conv3_w"], params["conv3_b"])
    flat = x.reshape(x.shape[0], -1)
    h = jnp.maximum(jnp.dot(flat, params["fc1_w"].T, precision=hp) + params["fc1_b"], 0.0)
    return jnp.dot(h, params["clf_w"].T, precision=hp) + params["clf_b"]


def init_params(key, in_channels=3, channels=8, n_out=10, input_dim=32):
    """Deterministic init matching the torch module's parameter shapes
    (uniform(-1/sqrt(fan_in), 1/sqrt(fan_in)), like nn.Conv2d/nn.Linear defaults)."""
    def uni(k, shape, fan_in):
        bound = float(fan_in) ** -0.5
        return jax.random.uniform(k, shape, jnp.float32, -bound, bound)

    c2 = channels * 2
    d = input_dim
    d = d - 2            # conv1 (3x3 valid)
    d = d // 2           # mp1
    d = d - 2            # conv2
    d = d // 2           # mp2
    d = d - 2            # conv3
    flat_dim = d * d * c2

    ks = jax.random.split(key, 10)
    return {
        "conv1_w": uni(ks[0], (channels, in_channels, 3, 3), in_channels * 9),
        "conv1_b": uni(ks[1], (channels,), in_channels * 9),
        "conv2_w": uni(ks[2], (c2, channels, 3, 3), channels * 9),
        "conv2_b": uni(ks[3], (c2,), channels * 9),
        "conv3_w": uni(ks[4], (c2, c2, 3, 3), c2 * 9),
        "conv3_b": uni(ks[5], (c2,), c2 * 9),
        "fc1_w":   uni(ks[6], (64, flat_dim), flat_dim),
        "fc1_b":   uni(ks[7], (64,), flat_dim),
        "clf_w":   uni(ks[8], (n_out, 64), 64),
        "clf_b":   uni(ks[9], (n_out,), 64),
    }


if __name__ == "__main__":
    key = jax.random.PRNGKey(0)
    pkey, xkey = jax.random.split(key)

    # 32x32 is the minimum comfortable spatial size for three valid 3x3 convs
    # with two 2x2 pools; channels kept small.
    batch, in_channels, channels, n_out, input_dim = 2, 3, 8, 10, 32

    params = init_params(pkey, in_channels, channels, n_out, input_dim)
    x = jax.random.normal(xkey, (batch, in_channels, input_dim, input_dim), jnp.float32)

    kparams = build_kernel_params(params, input_dim=input_dim)   # one-time prep
    fwd = jax.jit(conv3net_forward)
    out = fwd(kparams, x)
    jax.block_until_ready(out)
    assert out.shape == (batch, n_out), out.shape

    ref = jax.jit(conv3net_reference)(params, x)
    jax.block_until_ready(ref)
    max_diff = float(jnp.max(jnp.abs(out - ref)))
    if not jnp.allclose(out, ref, rtol=1e-2, atol=1e-2):
        raise AssertionError(f"Pallas/reference mismatch, max abs diff = {max_diff}")

    print("KERNEL_OK")
</pallas_src>

<mosaic_0001>
module attributes {stable_mosaic.version = 11 : i64} {
  func.func @_conv3net_kernel(%arg0: i32, %arg1: memref<1x32x96xf32, #tpu.memory_space<vmem>>, %arg2: memref<3x96x120xf32, #tpu.memory_space<vmem>>, %arg3: memref<3x96x120xf32, #tpu.memory_space<vmem>>, %arg4: memref<1x120xf32, #tpu.memory_space<vmem>>, %arg5: memref<15x30xf32, #tpu.memory_space<vmem>>, %arg6: memref<15x30xf32, #tpu.memory_space<vmem>>, %arg7: memref<3x120x112xf32, #tpu.memory_space<vmem>>, %arg8: memref<3x120x96xf32, #tpu.memory_space<vmem>>, %arg9: memref<1x96xf32, #tpu.memory_space<vmem>>, %arg10: memref<6x13xf32, #tpu.memory_space<vmem>>, %arg11: memref<6x13xf32, #tpu.memory_space<vmem>>, %arg12: memref<3x96x64xf32, #tpu.memory_space<vmem>>, %arg13: memref<1x64xf32, #tpu.memory_space<vmem>>, %arg14: memref<4x64x64xf32, #tpu.memory_space<vmem>>, %arg15: memref<1x64xf32, #tpu.memory_space<vmem>>, %arg16: memref<64x10xf32, #tpu.memory_space<vmem>>, %arg17: memref<1x10xf32, #tpu.memory_space<vmem>>, %arg18: memref<1x1x10xf32, #tpu.memory_space<vmem>>, %arg19: memref<15x120xf32, #tpu.memory_space<vmem>>, %arg20: memref<6x96xf32, #tpu.memory_space<vmem>>, %arg21: memref<4x64xf32, #tpu.memory_space<vmem>>) attributes {dimension_semantics = [#tpu.dimension_semantics<parallel>], iteration_bounds = array<i64: 2>, scalar_prefetch = 0 : i64, scratch_operands = 3 : i64, tpu.core_type = #tpu.core_type<tc>, window_params = [{transform_indices = @transform_0, window_bounds = array<i64: 1, 32, 96>}, {pipeline_mode = #tpu.pipeline_mode<synchronous>, transform_indices = @transform_1, window_bounds = array<i64: 3, 96, 120>}, {pipeline_mode = #tpu.pipeline_mode<synchronous>, transform_indices = @transform_2, window_bounds = array<i64: 3, 96, 120>}, {pipeline_mode = #tpu.pipeline_mode<synchronous>, transform_indices = @transform_3, window_bounds = array<i64: 1, 120>}, {pipeline_mode = #tpu.pipeline_mode<synchronous>, transform_indices = @transform_4, window_bounds = array<i64: 15, 30>}, {pipeline_mode = #tpu.pipeline_mode<synchronous>, transform_indices = @transform_5, window_bounds = array<i64: 15, 30>}, {pipeline_mode = #tpu.pipeline_mode<synchronous>, transform_indices = @transform_6, window_bounds = array<i64: 3, 120, 112>}, {pipeline_mode = #tpu.pipeline_mode<synchronous>, transform_indices = @transform_7, window_bounds = array<i64: 3, 120, 96>}, {pipeline_mode = #tpu.pipeline_mode<synchronous>, transform_indices = @transform_8, window_bounds = array<i64: 1, 96>}, {pipeline_mode = #tpu.pipeline_mode<synchronous>, transform_indices = @transform_9, window_bounds = array<i64: 6, 13>}, {pipeline_mode = #tpu.pipeline_mode<synchronous>, transform_indices = @transform_10, window_bounds = array<i64: 6, 13>}, {pipeline_mode = #tpu.pipeline_mode<synchronous>, transform_indices = @transform_11, window_bounds = array<i64: 3, 96, 64>}, {pipeline_mode = #tpu.pipeline_mode<synchronous>, transform_indices = @transform_12, window_bounds = array<i64: 1, 64>}, {pipeline_mode = #tpu.pipeline_mode<synchronous>, transform_indices = @transform_13, window_bounds = array<i64: 4, 64, 64>}, {pipeline_mode = #tpu.pipeline_mode<synchronous>, transform_indices = @transform_14, window_bounds = array<i64: 1, 64>}, {pipeline_mode = #tpu.pipeline_mode<synchronous>, transform_indices = @transform_15, window_bounds = array<i64: 64, 10>}, {pipeline_mode = #tpu.pipeline_mode<synchronous>, transform_indices = @transform_16, window_bounds = array<i64: 1, 10>}, {transform_indices = @transform_17, window_bounds = array<i64: 1, 1, 10>}]} {
    %cst = arith.constant 0.000000e+00 : f32
    %0 = vector.broadcast %cst : f32 to vector<30x120xf32>
    %cst_0 = arith.constant 0.000000e+00 : f32
    %1 = vector.broadcast %cst_0 : f32 to vector<30x120xf32>
    %c0 = arith.constant 0 : index
    %c0_1 = arith.constant 0 : index
    %c0_2 = arith.constant 0 : index
    %2 = vector.load %arg1[%c0, %c0_1, %c0_2] : memref<1x32x96xf32, #tpu.memory_space<vmem>>, vector<1x30x96xf32>
    %3 = vector.shape_cast %2 : vector<1x30x96xf32> to vector<30x96xf32>
    %c0_3 = arith.constant 0 : index
    %c0_4 = arith.constant 0 : index
    %c0_5 = arith.constant 0 : index
    %4 = vector.load %arg2[%c0_3, %c0_4, %c0_5] : memref<3x96x120xf32, #tpu.memory_space<vmem>>, vector<1x96x120xf32>
    %5 = vector.shape_cast %4 : vector<1x96x120xf32> to vector<96x120xf32>
    %cst_6 = arith.constant dense<0.000000e+00> : vector<30x120xf32>
    %6 = tpu.matmul %3, %5, %cst_6 {dimension_numbers = #tpu.dot_dimension_numbers<[1], [0], [0], [1], [0, 0, 1, 1], [], []>} : vector<30x96xf32>, vector<96x120xf32>, vector<30x120xf32> -> vector<30x120xf32>
    %7 = arith.addf %0, %6 : vector<30x120xf32>
    %c0_7 = arith.constant 0 : index
    %c0_8 = arith.constant 0 : index
    %c0_9 = arith.constant 0 : index
    %8 = vector.load %arg3[%c0_7, %c0_8, %c0_9] : memref<3x96x120xf32, #tpu.memory_space<vmem>>, vector<1x96x120xf32>
    %9 = vector.shape_cast %8 : vector<1x96x120xf32> to vector<96x120xf32>
    %cst_10 = arith.constant dense<0.000000e+00> : vector<30x120xf32>
    %10 = tpu.matmul %3, %9, %cst_10 {dimension_numbers = #tpu.dot_dimension_numbers<[1], [0], [0], [1], [0, 0, 1, 1], [], []>} : vector<30x96xf32>, vector<96x120xf32>, vector<30x120xf32> -> vector<30x120xf32>
    %11 = arith.addf %1, %10 : vector<30x120xf32>
    %c0_11 = arith.constant 0 : index
    %c1 = arith.constant 1 : index
    %c0_12 = arith.constant 0 : index
    %12 = vector.load %arg1[%c0_11, %c1, %c0_12] : memref<1x32x96xf32, #tpu.memory_space<vmem>>, vector<1x30x96xf32>
    %13 = vector.shape_cast %12 : vector<1x30x96xf32> to vector<30x96xf32>
    %c1_13 = arith.constant 1 : index
    %c0_14 = arith.constant 0 : index
    %c0_15 = arith.constant 0 : index
    %14 = vector.load %arg2[%c1_13, %c0_14, %c0_15] : memref<3x96x120xf32, #tpu.memory_space<vmem>>, vector<1x96x120xf32>
    %15 = vector.shape_cast %14 : vector<1x96x120xf32> to vector<96x120xf32>
    %cst_16 = arith.constant dense<0.000000e+00> : vector<30x120xf32>
    %16 = tpu.matmul %13, %15, %cst_16 {dimension_numbers = #tpu.dot_dimension_numbers<[1], [0], [0], [1], [0, 0, 1, 1], [], []>} : vector<30x96xf32>, vector<96x120xf32>, vector<30x120xf32> -> vector<30x120xf32>
    %17 = arith.addf %7, %16 : vector<30x120xf32>
    %c1_17 = arith.constant 1 : index
    %c0_18 = arith.constant 0 : index
    %c0_19 = arith.constant 0 : index
    %18 = vector.load %arg3[%c1_17, %c0_18, %c0_19] : memref<3x96x120xf32, #tpu.memory_space<vmem>>, vector<1x96x120xf32>
    %19 = vector.shape_cast %18 : vector<1x96x120xf32> to vector<96x120xf32>
    %cst_20 = arith.constant dense<0.000000e+00> : vector<30x120xf32>
    %20 = tpu.matmul %13, %19, %cst_20 {dimension_numbers = #tpu.dot_dimension_numbers<[1], [0], [0], [1], [0, 0, 1, 1], [], []>} : vector<30x96xf32>, vector<96x120xf32>, vector<30x120xf32> -> vector<30x120xf32>
    %21 = arith.addf %11, %20 : vector<30x120xf32>
    %c0_21 = arith.constant 0 : index
    %c2 = arith.constant 2 : index
    %c0_22 = arith.constant 0 : index
    %22 = vector.load %arg1[%c0_21, %c2, %c0_22] : memref<1x32x96xf32, #tpu.memory_space<vmem>>, vector<1x30x96xf32>
    %23 = vector.shape_cast %22 : vector<1x30x96xf32> to vector<30x96xf32>
    %c2_23 = arith.constant 2 : index
    %c0_24 = arith.constant 0 : index
    %c0_25 = arith.constant 0 : index
    %24 = vector.load %arg2[%c2_23, %c0_24, %c0_25] : memref<3x96x120xf32, #tpu.memory_space<vmem>>, vector<1x96x120xf32>
    %25 = vector.shape_cast %24 : vector<1x96x120xf32> to vector<96x120xf32>
    %cst_26 = arith.constant dense<0.000000e+00> : vector<30x120xf32>
    %26 = tpu.matmul %23, %25, %cst_26 {dimension_numbers = #tpu.dot_dimension_numbers<[1], [0], [0], [1], [0, 0, 1, 1], [], []>} : vector<30x96xf32>, vector<96x120xf32>, vector<30x120xf32> -> vector<30x120xf32>
    %27 = arith.addf %17, %26 : vector<30x120xf32>
    %c2_27 = arith.constant 2 : index
    %c0_28 = arith.constant 0 : index
    %c0_29 = arith.constant 0 : index
    %28 = vector.load %arg3[%c2_27, %c0_28, %c0_29] : memref<3x96x120xf32, #tpu.memory_space<vmem>>, vector<1x96x120xf32>
    %29 = vector.shape_cast %28 : vector<1x96x120xf32> to vector<96x120xf32>
    %cst_30 = arith.constant dense<0.000000e+00> : vector<30x120xf32>
    %30 = tpu.matmul %23, %29, %cst_30 {dimension_numbers = #tpu.dot_dimension_numbers<[1], [0], [0], [1], [0, 0, 1, 1], [], []>} : vector<30x96xf32>, vector<96x120xf32>, vector<30x120xf32> -> vector<30x120xf32>
    %31 = arith.addf %21, %30 : vector<30x120xf32>
    %32 = arith.maximumf %27, %31 : vector<30x120xf32>
    %c0_31 = arith.constant 0 : index
    %c0_32 = arith.constant 0 : index
    %33 = vector.load %arg4[%c0_31, %c0_32] : memref<1x120xf32, #tpu.memory_space<vmem>>, vector<1x120xf32>
    %34 = vector.broadcast %33 : vector<1x120xf32> to vector<30x120xf32>
    %35 = arith.addf %32, %34 : vector<30x120xf32>
    %cst_33 = arith.constant 0.000000e+00 : f32
    %36 = vector.broadcast %cst_33 : f32 to vector<30x120xf32>
    %37 = arith.maximumf %35, %36 : vector<30x120xf32>
    %c0_34 = arith.constant 0 : index
    %c0_35 = arith.constant 0 : index
    %38 = vector.load %arg5[%c0_34, %c0_35] : memref<15x30xf32, #tpu.memory_space<vmem>>, vector<15x30xf32>
    %cst_36 = arith.constant dense<0.000000e+00> : vector<15x120xf32>
    %39 = tpu.matmul %38, %37, %cst_36 {dimension_numbers = #tpu.dot_dimension_numbers<[1], [0], [0], [1], [0, 0, 1, 1], [], []>} : vector<15x30xf32>, vector<30x120xf32>, vector<15x120xf32> -> vector<15x120xf32>
    %c0_37 = arith.constant 0 : index
    %c0_38 = arith.constant 0 : index
    %40 = vector.load %arg6[%c0_37, %c0_38] : memref<15x30xf32, #tpu.memory_space<vmem>>, vector<15x30xf32>
    %cst_39 = arith.constant dense<0.000000e+00> : vector<15x120xf32>
    %41 = tpu.matmul %40, %37, %cst_39 {dimension_numbers = #tpu.dot_dimension_numbers<[1], [0], [0], [1], [0, 0, 1, 1], [], []>} : vector<15x30xf32>, vector<30x120xf32>, vector<15x120xf32> -> vector<15x120xf32>
    %42 = arith.maximumf %39, %41 : vector<15x120xf32>
    %c0_40 = arith.constant 0 : index
    %c0_41 = arith.constant 0 : index
    %43 = vector.load %arg19[%c0_40, %c0_41] : memref<15x120xf32, #tpu.memory_space<vmem>>, vector<15x120xf32>
    tpu.vector_store %arg19[%c0_40, %c0_41], %42 {strides = array<i32>} : memref<15x120xf32, #tpu.memory_space<vmem>>, vector<15x120xf32>,
    %cst_42 = arith.constant 0.000000e+00 : f32
    %44 = vector.broadcast %cst_42 : f32 to vector<13x112xf32>
    %cst_43 = arith.constant 0.000000e+00 : f32
    %45 = vector.broadcast %cst_43 : f32 to vector<13x96xf32>
    %c0_44 = arith.constant 0 : index
    %c0_45 = arith.constant 0 : index
    %46 = vector.load %arg19[%c0_44, %c0_45] : memref<15x120xf32, #tpu.memory_space<vmem>>, vector<13x120xf32>
    %c0_46 = arith.constant 0 : index
    %c0_47 = arith.constant 0 : index
    %c0_48 = arith.constant 0 : index
    %47 = vector.load %arg7[%c0_46, %c0_47, %c0_48] : memref<3x120x112xf32, #tpu.memory_space<vmem>>, vector<1x120x112xf32>
    %48 = vector.shape_cast %47 : vector<1x120x112xf32> to vector<120x112xf32>
    %cst_49 = arith.constant dense<0.000000e+00> : vector<13x112xf32>
    %49 = tpu.matmul %46, %48, %cst_49 {dimension_numbers = #tpu.dot_dimension_numbers<[1], [0], [0], [1], [0, 0, 1, 1], [], []>} : vector<13x120xf32>, vector<120x112xf32>, vector<13x112xf32> -> vector<13x112xf32>
    %50 = arith.addf %44, %49 : vector<13x112xf32>
    %c0_50 = arith.constant 0 : index
    %c0_51 = arith.constant 0 : index
    %c0_52 = arith.constant 0 : index
    %51 = vector.load %arg8[%c0_50, %c0_51, %c0_52] : memref<3x120x96xf32, #tpu.memory_space<vmem>>, vector<1x120x96xf32>
    %52 = vector.shape_cast %51 : vector<1x120x96xf32> to vector<120x96xf32>
    %cst_53 = arith.constant dense<0.000000e+00> : vector<13x96xf32>
    %53 = tpu.matmul %46, %52, %cst_53 {dimension_numbers = #tpu.dot_dimension_numbers<[1], [0], [0], [1], [0, 0, 1, 1], [], []>} : vector<13x120xf32>, vector<120x96xf32>, vector<13x96xf32> -> vector<13x96xf32>
    %54 = arith.addf %45, %53 : vector<13x96xf32>
    %c1_54 = arith.constant 1 : index
    %c0_55 = arith.constant 0 : index
    %55 = vector.load %arg19[%c1_54, %c0_55] : memref<15x120xf32, #tpu.memory_space<vmem>>, vector<13x120xf32>
    %c1_56 = arith.constant 1 : index
    %c0_57 = arith.constant 0 : index
    %c0_58 = arith.constant 0 : index
    %56 = vector.load %arg7[%c1_56, %c0_57, %c0_58] : memref<3x120x112xf32, #tpu.memory_space<vmem>>, vector<1x120x112xf32>
    %57 = vector.shape_cast %56 : vector<1x120x112xf32> to vector<120x112xf32>
    %cst_59 = arith.constant dense<0.000000e+00> : vector<13x112xf32>
    %58 = tpu.matmul %55, %57, %cst_59 {dimension_numbers = #tpu.dot_dimension_numbers<[1], [0], [0], [1], [0, 0, 1, 1], [], []>} : vector<13x120xf32>, vector<120x112xf32>, vector<13x112xf32> -> vector<13x112xf32>
    %59 = arith.addf %50, %58 : vector<13x112xf32>
    %c1_60 = arith.constant 1 : index
    %c0_61 = arith.constant 0 : index
    %c0_62 = arith.constant 0 : index
    %60 = vector.load %arg8[%c1_60, %c0_61, %c0_62] : memref<3x120x96xf32, #tpu.memory_space<vmem>>, vector<1x120x96xf32>
    %61 = vector.shape_cast %60 : vector<1x120x96xf32> to vector<120x96xf32>
    %cst_63 = arith.constant dense<0.000000e+00> : vector<13x96xf32>
    %62 = tpu.matmul %55, %61, %cst_63 {dimension_numbers = #tpu.dot_dimension_numbers<[1], [0], [0], [1], [0, 0, 1, 1], [], []>} : vector<13x120xf32>, vector<120x96xf32>, vector<13x96xf32> -> vector<13x96xf32>
    %63 = arith.addf %54, %62 : vector<13x96xf32>
    %c2_64 = arith.constant 2 : index
    %c0_65 = arith.constant 0 : index
    %64 = vector.load %arg19[%c2_64, %c0_65] : memref<15x120xf32, #tpu.memory_space<vmem>>, vector<13x120xf32>
    %c2_66 = arith.constant 2 : index
    %c0_67 = arith.constant 0 : index
    %c0_68 = arith.constant 0 : index
    %65 = vector.load %arg7[%c2_66, %c0_67, %c0_68] : memref<3x120x112xf32, #tpu.memory_space<vmem>>, vector<1x120x112xf32>
    %66 = vector.shape_cast %65 : vector<1x120x112xf32> to vector<120x112xf32>
    %cst_69 = arith.constant dense<0.000000e+00> : vector<13x112xf32>
    %67 = tpu.matmul %64, %66, %cst_69 {dimension_numbers = #tpu.dot_dimension_numbers<[1], [0], [0], [1], [0, 0, 1, 1], [], []>} : vector<13x120xf32>, vector<120x112xf32>, vector<13x112xf32> -> vector<13x112xf32>
    %68 = arith.addf %59, %67 : vector<13x112xf32>
    %c2_70 = arith.constant 2 : index
    %c0_71 = arith.constant 0 : index
    %c0_72 = arith.constant 0 : index
    %69 = vector.load %arg8[%c2_70, %c0_71, %c0_72] : memref<3x120x96xf32, #tpu.memory_space<vmem>>, vector<1x120x96xf32>
    %70 = vector.shape_cast %69 : vector<1x120x96xf32> to vector<120x96xf32>
    %cst_73 = arith.constant dense<0.000000e+00> : vector<13x96xf32>
    %71 = tpu.matmul %64, %70, %cst_73 {dimension_numbers = #tpu.dot_dimension_numbers<[1], [0], [0], [1], [0, 0, 1, 1], [], []>} : vector<13x120xf32>, vector<120x96xf32>, vector<13x96xf32> -> vector<13x96xf32>
    %72 = arith.addf %63, %71 : vector<13x96xf32>
    %73 = vector.extract_strided_slice %68 {offsets = [0, 0], sizes = [13, 96], strides = [1, 1]} : vector<13x112xf32> to vector<13x96xf32>
    %74 = arith.maximumf %73, %72 : vector<13x96xf32>
    %c0_74 = arith.constant 0 : index
    %c0_75 = arith.constant 0 : index
    %75 = vector.load %arg9[%c0_74, %c0_75] : memref<1x96xf32, #tpu.memory_space<vmem>>, vector<1x96xf32>
    %76 = vector.broadcast %75 : vector<1x96xf32> to vector<13x96xf32>
    %77 = arith.addf %74, %76 : vector<13x96xf32>
    %cst_76 = arith.constant 0.000000e+00 : f32
    %78 = vector.broadcast %cst_76 : f32 to vector<13x96xf32>
    %79 = arith.maximumf %77, %78 : vector<13x96xf32>
    %c0_77 = arith.constant 0 : index
    %c0_78 = arith.constant 0 : index
    %80 = vector.load %arg10[%c0_77, %c0_78] : memref<6x13xf32, #tpu.memory_space<vmem>>, vector<6x13xf32>
    %cst_79 = arith.constant dense<0.000000e+00> : vector<6x96xf32>
    %81 = tpu.matmul %80, %79, %cst_79 {dimension_numbers = #tpu.dot_dimension_numbers<[1], [0], [0], [1], [0, 0, 1, 1], [], []>} : vector<6x13xf32>, vector<13x96xf32>, vector<6x96xf32> -> vector<6x96xf32>
    %c0_80 = arith.constant 0 : index
    %c0_81 = arith.constant 0 : index
    %82 = vector.load %arg11[%c0_80, %c0_81] : memref<6x13xf32, #tpu.memory_space<vmem>>, vector<6x13xf32>
    %cst_82 = arith.constant dense<0.000000e+00> : vector<6x96xf32>
    %83 = tpu.matmul %82, %79, %cst_82 {dimension_numbers = #tpu.dot_dimension_numbers<[1], [0], [0], [1], [0, 0, 1, 1], [], []>} : vector<6x13xf32>, vector<13x96xf32>, vector<6x96xf32> -> vector<6x96xf32>
    %84 = arith.maximumf %81, %83 : vector<6x96xf32>
    %c0_83 = arith.constant 0 : index
    %c0_84 = arith.constant 0 : index
    %85 = vector.load %arg20[%c0_83, %c0_84] : memref<6x96xf32, #tpu.memory_space<vmem>>, vector<6x96xf32>
    tpu.vector_store %arg20[%c0_83, %c0_84], %84 {strides = array<i32>} : memref<6x96xf32, #tpu.memory_space<vmem>>, vector<6x96xf32>,
    %cst_85 = arith.constant 0.000000e+00 : f32
    %86 = vector.broadcast %cst_85 : f32 to vector<4x64xf32>
    %c0_86 = arith.constant 0 : index
    %c0_87 = arith.constant 0 : index
    %87 = vector.load %arg20[%c0_86, %c0_87] : memref<6x96xf32, #tpu.memory_space<vmem>>, vector<4x96xf32>
    %c0_88 = arith.constant 0 : index
    %c0_89 = arith.constant 0 : index
    %c0_90 = arith.constant 0 : index
    %88 = vector.load %arg12[%c0_88, %c0_89, %c0_90] : memref<3x96x64xf32, #tpu.memory_space<vmem>>, vector<1x96x64xf32>
    %89 = vector.shape_cast %88 : vector<1x96x64xf32> to vector<96x64xf32>
    %cst_91 = arith.constant dense<0.000000e+00> : vector<4x64xf32>
    %90 = tpu.matmul %87, %89, %cst_91 {dimension_numbers = #tpu.dot_dimension_numbers<[1], [0], [0], [1], [0, 0, 1, 1], [], []>} : vector<4x96xf32>, vector<96x64xf32>, vector<4x64xf32> -> vector<4x64xf32>
    %91 = arith.addf %86, %90 : vector<4x64xf32>
    %c1_92 = arith.constant 1 : index
    %c0_93 = arith.constant 0 : index
    %92 = vector.load %arg20[%c1_92, %c0_93] : memref<6x96xf32, #tpu.memory_space<vmem>>, vector<4x96xf32>
    %c1_94 = arith.constant 1 : index
    %c0_95 = arith.constant 0 : index
    %c0_96 = arith.constant 0 : index
    %93 = vector.load %arg12[%c1_94, %c0_95, %c0_96] : memref<3x96x64xf32, #tpu.memory_space<vmem>>, vector<1x96x64xf32>
    %94 = vector.shape_cast %93 : vector<1x96x64xf32> to vector<96x64xf32>
    %cst_97 = arith.constant dense<0.000000e+00> : vector<4x64xf32>
    %95 = tpu.matmul %92, %94, %cst_97 {dimension_numbers = #tpu.dot_dimension_numbers<[1], [0], [0], [1], [0, 0, 1, 1], [], []>} : vector<4x96xf32>, vector<96x64xf32>, vector<4x64xf32> -> vector<4x64xf32>
    %96 = arith.addf %91, %95 : vector<4x64xf32>
    %c2_98 = arith.constant 2 : index
    %c0_99 = arith.constant 0 : index
    %97 = vector.load %arg20[%c2_98, %c0_99] : memref<6x96xf32, #tpu.memory_space<vmem>>, vector<4x96xf32>
    %c2_100 = arith.constant 2 : index
    %c0_101 = arith.constant 0 : index
    %c0_102 = arith.constant 0 : index
    %98 = vector.load %arg12[%c2_100, %c0_101, %c0_102] : memref<3x96x64xf32, #tpu.memory_space<vmem>>, vector<1x96x64xf32>
    %99 = vector.shape_cast %98 : vector<1x96x64xf32> to vector<96x64xf32>
    %cst_103 = arith.constant dense<0.000000e+00> : vector<4x64xf32>
    %100 = tpu.matmul %97, %99, %cst_103 {dimension_numbers = #tpu.dot_dimension_numbers<[1], [0], [0], [1], [0, 0, 1, 1], [], []>} : vector<4x96xf32>, vector<96x64xf32>, vector<4x64xf32> -> vector<4x64xf32>
    %101 = arith.addf %96, %100 : vector<4x64xf32>
    %c0_104 = arith.constant 0 : index
    %c0_105 = arith.constant 0 : index
    %102 = vector.load %arg13[%c0_104, %c0_105] : memref<1x64xf32, #tpu.memory_space<vmem>>, vector<1x64xf32>
    %103 = vector.broadcast %102 : vector<1x64xf32> to vector<4x64xf32>
    %104 = arith.addf %101, %103 : vector<4x64xf32>
    %cst_106 = arith.constant 0.000000e+00 : f32
    %105 = vector.broadcast %cst_106 : f32 to vector<4x64xf32>
    %106 = arith.maximumf %104, %105 : vector<4x64xf32>
    %c0_107 = arith.constant 0 : index
    %c0_108 = arith.constant 0 : index
    %107 = vector.load %arg21[%c0_107, %c0_108] : memref<4x64xf32, #tpu.memory_space<vmem>>, vector<4x64xf32>
    tpu.vector_store %arg21[%c0_107, %c0_108], %106 {strides = array<i32>} : memref<4x64xf32, #tpu.memory_space<vmem>>, vector<4x64xf32>,
    %c0_109 = arith.constant 0 : index
    %c0_110 = arith.constant 0 : index
    %108 = vector.load %arg15[%c0_109, %c0_110] : memref<1x64xf32, #tpu.memory_space<vmem>>, vector<1x64xf32>
    %c0_111 = arith.constant 0 : index
    %c0_112 = arith.constant 0 : index
    %109 = vector.load %arg21[%c0_111, %c0_112] : memref<4x64xf32, #tpu.memory_space<vmem>>, vector<1x64xf32>
    %c0_113 = arith.constant 0 : index
    %c0_114 = arith.constant 0 : index
    %c0_115 = arith.constant 0 : index
    %110 = vector.load %arg14[%c0_113, %c0_114, %c0_115] : memref<4x64x64xf32, #tpu.memory_space<vmem>>, vector<1x64x64xf32>
    %111 = vector.shape_cast %110 : vector<1x64x64xf32> to vector<64x64xf32>
    %cst_116 = arith.constant dense<0.000000e+00> : vector<1x64xf32>
    %112 = tpu.matmul %109, %111, %cst_116 {dimension_numbers = #tpu.dot_dimension_numbers<[1], [0], [0], [1], [0, 0, 1, 1], [], []>} : vector<1x64xf32>, vector<64x64xf32>, vector<1x64xf32> -> vector<1x64xf32>
    %113 = arith.addf %108, %112 : vector<1x64xf32>
    %c1_117 = arith.constant 1 : index
    %c0_118 = arith.constant 0 : index
    %114 = vector.load %arg21[%c1_117, %c0_118] : memref<4x64xf32, #tpu.memory_space<vmem>>, vector<1x64xf32>
    %c1_119 = arith.constant 1 : index
    %c0_120 = arith.constant 0 : index
    %c0_121 = arith.constant 0 : index
    %115 = vector.load %arg14[%c1_119, %c0_120, %c0_121] : memref<4x64x64xf32, #tpu.memory_space<vmem>>, vector<1x64x64xf32>
    %116 = vector.shape_cast %115 : vector<1x64x64xf32> to vector<64x64xf32>
    %cst_122 = arith.constant dense<0.000000e+00> : vector<1x64xf32>
    %117 = tpu.matmul %114, %116, %cst_122 {dimension_numbers = #tpu.dot_dimension_numbers<[1], [0], [0], [1], [0, 0, 1, 1], [], []>} : vector<1x64xf32>, vector<64x64xf32>, vector<1x64xf32> -> vector<1x64xf32>
    %118 = arith.addf %113, %117 : vector<1x64xf32>
    %c2_123 = arith.constant 2 : index
    %c0_124 = arith.constant 0 : index
    %119 = vector.load %arg21[%c2_123, %c0_124] : memref<4x64xf32, #tpu.memory_space<vmem>>, vector<1x64xf32>
    %c2_125 = arith.constant 2 : index
    %c0_126 = arith.constant 0 : index
    %c0_127 = arith.constant 0 : index
    %120 = vector.load %arg14[%c2_125, %c0_126, %c0_127] : memref<4x64x64xf32, #tpu.memory_space<vmem>>, vector<1x64x64xf32>
    %121 = vector.shape_cast %120 : vector<1x64x64xf32> to vector<64x64xf32>
    %cst_128 = arith.constant dense<0.000000e+00> : vector<1x64xf32>
    %122 = tpu.matmul %119, %121, %cst_128 {dimension_numbers = #tpu.dot_dimension_numbers<[1], [0], [0], [1], [0, 0, 1, 1], [], []>} : vector<1x64xf32>, vector<64x64xf32>, vector<1x64xf32> -> vector<1x64xf32>
    %123 = arith.addf %118, %122 : vector<1x64xf32>
    %c3 = arith.constant 3 : index
    %c0_129 = arith.constant 0 : index
    %124 = vector.load %arg21[%c3, %c0_129] : memref<4x64xf32, #tpu.memory_space<vmem>>, vector<1x64xf32>
    %c3_130 = arith.constant 3 : index
    %c0_131 = arith.constant 0 : index
    %c0_132 = arith.constant 0 : index
    %125 = vector.load %arg14[%c3_130, %c0_131, %c0_132] : memref<4x64x64xf32, #tpu.memory_space<vmem>>, vector<1x64x64xf32>
    %126 = vector.shape_cast %125 : vector<1x64x64xf32> to vector<64x64xf32>
    %cst_133 = arith.constant dense<0.000000e+00> : vector<1x64xf32>
    %127 = tpu.matmul %124, %126, %cst_133 {dimension_numbers = #tpu.dot_dimension_numbers<[1], [0], [0], [1], [0, 0, 1, 1], [], []>} : vector<1x64xf32>, vector<64x64xf32>, vector<1x64xf32> -> vector<1x64xf32>
    %128 = arith.addf %123, %127 : vector<1x64xf32>
    %cst_134 = arith.constant 0.000000e+00 : f32
    %129 = vector.broadcast %cst_134 : f32 to vector<1x64xf32>
    %130 = arith.maximumf %128, %129 : vector<1x64xf32>
    %c0_135 = arith.constant 0 : index
    %c0_136 = arith.constant 0 : index
    %131 = vector.load %arg16[%c0_135, %c0_136] : memref<64x10xf32, #tpu.memory_space<vmem>>, vector<64x10xf32>
    %cst_137 = arith.constant dense<0.000000e+00> : vector<1x10xf32>
    %132 = tpu.matmul %130, %131, %cst_137 {dimension_numbers = #tpu.dot_dimension_numbers<[1], [0], [0], [1], [0, 0, 1, 1], [], []>} : vector<1x64xf32>, vector<64x10xf32>, vector<1x10xf32> -> vector<1x10xf32>
    %c0_138 = arith.constant 0 : index
    %c0_139 = arith.constant 0 : index
    %133 = vector.load %arg17[%c0_138, %c0_139] : memref<1x10xf32, #tpu.memory_space<vmem>>, vector<1x10xf32>
    %134 = arith.addf %132, %133 : vector<1x10xf32>
    %c0_140 = arith.constant 0 : index
    %c0_141 = arith.constant 0 : index
    %c0_142 = arith.constant 0 : index
    %135 = vector.load %arg18[%c0_140, %c0_141, %c0_142] : memref<1x1x10xf32, #tpu.memory_space<vmem>>, vector<1x1x10xf32>
    %136 = vector.shape_cast %135 : vector<1x1x10xf32> to vector<1x10xf32>
    %137 = vector.shape_cast %134 : vector<1x10xf32> to vector<1x1x10xf32>
    tpu.vector_store %arg18[%c0_140, %c0_141, %c0_142], %137 {strides = array<i32>} : memref<1x1x10xf32, #tpu.memory_space<vmem>>, vector<1x1x10xf32>,
    return
  }
  func.func @transform_0(%arg0: i32) -> (i32, i32, i32) {
    %c0_i32 = arith.constant 0 : i32
    %c0_i32_0 = arith.constant 0 : i32
    %c0_i32_1 = arith.constant 0 : i32
    return %arg0, %c0_i32, %c0_i32_0 : i32, i32, i32
  }
  func.func @transform_1(%arg0: i32) -> (i32, i32, i32) {
    %c0_i32 = arith.constant 0 : i32
    %c0_i32_0 = arith.constant 0 : i32
    %c0_i32_1 = arith.constant 0 : i32
    %c0_i32_2 = arith.constant 0 : i32
    return %c0_i32, %c0_i32_0, %c0_i32_1 : i32, i32, i32
  }
  func.func @transform_2(%arg0: i32) -> (i32, i32, i32) {
    %c0_i32 = arith.constant 0 : i32
    %c0_i32_0 = arith.constant 0 : i32
    %c0_i32_1 = arith.constant 0 : i32
    %c0_i32_2 = arith.constant 0 : i32
    return %c0_i32, %c0_i32_0, %c0_i32_1 : i32, i32, i32
  }
  func.func @transform_3(%arg0: i32) -> (i32, i32) {
    %c0_i32 = arith.constant 0 : i32
    %c0_i32_0 = arith.constant 0 : i32
    %c0_i32_1 = arith.constant 0 : i32
    return %c0_i32, %c0_i32_0 : i32, i32
  }
  func.func @transform_4(%arg0: i32) -> (i32, i32) {
    %c0_i32 = arith.constant 0 : i32
    %c0_i32_0 = arith.constant 0 : i32
    %c0_i32_1 = arith.constant 0 : i32
    return %c0_i32, %c0_i32_0 : i32, i32
  }
  func.func @transform_5(%arg0: i32) -> (i32, i32) {
    %c0_i32 = arith.constant 0 : i32
    %c0_i32_0 = arith.constant 0 : i32
    %c0_i32_1 = arith.constant 0 : i32
    return %c0_i32, %c0_i32_0 : i32, i32
  }
  func.func @transform_6(%arg0: i32) -> (i32, i32, i32) {
    %c0_i32 = arith.constant 0 : i32
    %c0_i32_0 = arith.constant 0 : i32
    %c0_i32_1 = arith.constant 0 : i32
    %c0_i32_2 = arith.constant 0 : i32
    return %c0_i32, %c0_i32_0, %c0_i32_1 : i32, i32, i32
  }
  func.func @transform_7(%arg0: i32) -> (i32, i32, i32) {
    %c0_i32 = arith.constant 0 : i32
    %c0_i32_0 = arith.constant 0 : i32
    %c0_i32_1 = arith.constant 0 : i32
    %c0_i32_2 = arith.constant 0 : i32
    return %c0_i32, %c0_i32_0, %c0_i32_1 : i32, i32, i32
  }
  func.func @transform_8(%arg0: i32) -> (i32, i32) {
    %c0_i32 = arith.constant 0 : i32
    %c0_i32_0 = arith.constant 0 : i32
    %c0_i32_1 = arith.constant 0 : i32
    return %c0_i32, %c0_i32_0 : i32, i32
  }
  func.func @transform_9(%arg0: i32) -> (i32, i32) {
    %c0_i32 = arith.constant 0 : i32
    %c0_i32_0 = arith.constant 0 : i32
    %c0_i32_1 = arith.constant 0 : i32
    return %c0_i32, %c0_i32_0 : i32, i32
  }
  func.func @transform_10(%arg0: i32) -> (i32, i32) {
    %c0_i32 = arith.constant 0 : i32
    %c0_i32_0 = arith.constant 0 : i32
    %c0_i32_1 = arith.constant 0 : i32
    return %c0_i32, %c0_i32_0 : i32, i32
  }
  func.func @transform_11(%arg0: i32) -> (i32, i32, i32) {
    %c0_i32 = arith.constant 0 : i32
    %c0_i32_0 = arith.constant 0 : i32
    %c0_i32_1 = arith.constant 0 : i32
    %c0_i32_2 = arith.constant 0 : i32
    return %c0_i32, %c0_i32_0, %c0_i32_1 : i32, i32, i32
  }
  func.func @transform_12(%arg0: i32) -> (i32, i32) {
    %c0_i32 = arith.constant 0 : i32
    %c0_i32_0 = arith.constant 0 : i32
    %c0_i32_1 = arith.constant 0 : i32
    return %c0_i32, %c0_i32_0 : i32, i32
  }
  func.func @transform_13(%arg0: i32) -> (i32, i32, i32) {
    %c0_i32 = arith.constant 0 : i32
    %c0_i32_0 = arith.constant 0 : i32
    %c0_i32_1 = arith.constant 0 : i32
    %c0_i32_2 = arith.constant 0 : i32
    return %c0_i32, %c0_i32_0, %c0_i32_1 : i32, i32, i32
  }
  func.func @transform_14(%arg0: i32) -> (i32, i32) {
    %c0_i32 = arith.constant 0 : i32
    %c0_i32_0 = arith.constant 0 : i32
    %c0_i32_1 = arith.constant 0 : i32
    return %c0_i32, %c0_i32_0 : i32, i32
  }
  func.func @transform_15(%arg0: i32) -> (i32, i32) {
    %c0_i32 = arith.constant 0 : i32
    %c0_i32_0 = arith.constant 0 : i32
    %c0_i32_1 = arith.constant 0 : i32
    return %c0_i32, %c0_i32_0 : i32, i32
  }
  func.func @transform_16(%arg0: i32) -> (i32, i32) {
    %c0_i32 = arith.constant 0 : i32
    %c0_i32_0 = arith.constant 0 : i32
    %c0_i32_1 = arith.constant 0 : i32
    return %c0_i32, %c0_i32_0 : i32, i32
  }
  func.func @transform_17(%arg0: i32) -> (i32, i32, i32) {
    %c0_i32 = arith.constant 0 : i32
    %c0_i32_0 = arith.constant 0 : i32
    %c0_i32_1 = arith.constant 0 : i32
    return %arg0, %c0_i32, %c0_i32_0 : i32, i32, i32
  }
}

</mosaic_0001>

<bundles_post_ra>
// kernel: conv3net_forward.1
= control target key start
LH: loop header
LB: loop body
LE: loop exit
PB: predicated region body
PF: predicated region fallthrough
CT: control target
= control target key end

     0   :  { %s5672_s0 = inlined_call_operand.vmem [shape: f32[2,32,96], index: 0, kind: input, shape index: {}]   ;;  %s5673_s1 = inlined_call_operand.vmem [shape: f32[3,96,120], index: 1, kind: input, shape index: {}]   ;;  %s5674_s2 = inlined_call_operand.vmem [shape: f32[3,96,120], index: 2, kind: input, shape index: {}]   ;;  %s5675_s3 = inlined_call_operand.vmem [shape: f32[1,120], index: 3, kind: input, shape index: {}]   ;;  %s5676_s4 = inlined_call_operand.vmem [shape: f32[15,30], index: 4, kind: input, shape index: {}]   ;;  %s5677_s5 = inlined_call_operand.vmem [shape: f32[15,30], index: 5, kind: input, shape index: {}]   ;;  %s5678_s6 = inlined_call_operand.vmem [shape: f32[3,120,112], index: 6, kind: input, shape index: {}]   ;;  %s5679_s7 = inlined_call_operand.vmem [shape: f32[3,120,96], index: 7, kind: input, shape index: {}]   ;;  %s5680_s8 = inlined_call_operand.vmem [shape: f32[1,96], index: 8, kind: input, shape index: {}]   ;;  %s5681_s9 = inlined_call_operand.vmem [shape: f32[6,13], index: 9, kind: input, shape index: {}]   ;;  %s5682_s10 = inlined_call_operand.vmem [shape: f32[6,13], index: 10, kind: input, shape index: {}]   ;;  %s5683_s11 = inlined_call_operand.vmem [shape: f32[3,96,64], index: 11, kind: input, shape index: {}]   ;;  %s5684_s12 = inlined_call_operand.vmem [shape: f32[1,64], index: 12, kind: input, shape index: {}]   ;;  %s5685_s13 = inlined_call_operand.vmem [shape: f32[4,64,64], index: 13, kind: input, shape index: {}]   ;;  %s5686_s14 = inlined_call_operand.vmem [shape: f32[1,64], index: 14, kind: input, shape index: {}]   ;;  %s5687_s15 = inlined_call_operand.vmem [shape: f32[64,10], index: 15, kind: input, shape index: {}]   ;;  %s5688_s16 = inlined_call_operand.vmem [shape: f32[1,10], index: 16, kind: input, shape index: {}]   ;;  %s5689_s17 = inlined_call_operand.hbm [shape: f32[2,1,10], index: 17, kind: output, shape index: {}]  }
   0x1   :  { %5698 = sst [smem:[#allocation14_spill]] %s5672_s0 }
   0x2   :  { %5699 = sst [smem:[#allocation15_spill]] %s5673_s1 }
   0x3   :  { %5700 = sst [smem:[#allocation16_spill]] %s5688_s16 }
   0x4   :  { %5701 = sst [smem:[#allocation17_spill]] %s5689_s17 }
   0x5   :  { %22 = vsyncpa [#allocation6], 0 }
   0x6   :  { %24 = vsyncpa [#allocation6 + $0x1], 0  ;;  %s4688_s24 = smov 0   ;;  %s4690_s25 = smov 0  }
   0x7   :  { %s4692_s26 = smov 0   ;;  %s4694_s27 = smov 0  }
   0x8 LB: > { %5702 = sst [smem:[#allocation8_spill]] %s4579_s24  ;;  %s4709_s28 = sadd.s32 4294967295, %s4591_s27   ;;  %s4591_s27 = sphi %s4694_s27, %s5719_s27   ;;  %s4587_s26 = sphi %s4692_s26, %s5721_s26   ;;  %s4583_s25 = sphi %s4690_s25, %s5723_s25   ;;  %s4579_s24 = sphi %s4688_s24, %s5722_s24  }
   0x9   : > { %5703 = sst [smem:[#allocation9_spill]] %s4587_s26  ;;  %s2888_s29 = sadd.s32 4294967294, %s4591_s27  }
   0xa   : > { %5704 = sst [smem:[#allocation10_spill]] %s4591_s27  ;;  %s4713_s0 = sadd.s32 1, %s4591_s27  }
   0xb   : > { %5705 = sst [smem:[#allocation11_spill]] %s4713_s0  ;;  %s399_s30 = sadd.s32 1, %s4587_s26 }
   0xc   : > { %s396_s18 = ssub.s32 %s4591_s27, %s4713_s0  ;;  %p409_p0 = scmp.ne.s32.totalorder %s4587_s26, %s4583_s25 }
   0xd   : > { %p397_p1 = scmp.eq.s32.totalorder %s396_s18, 0  ;;  %p410_p2 = scmp.eq.s32.totalorder %s4709_s28, 1 }
   0xe   : > { %p415_p3 = scmp.ne.s32.totalorder %s4583_s25, %s4579_s24  ;;  %p416_p4 = scmp.eq.s32.totalorder %s2888_s29, 1 }
   0xf   : > { %s4724_s19 = scalar_select %p397_p1, %s4587_s26, %s399_s30  }
  0x10   : > { %p4726_p5 = por %p410_p2, %p409_p0  ;;  %p4730_p6 = por %p416_p4, %p415_p3 }
  0x11   : > { %5706 = sst [smem:[#allocation12_spill]] %s4724_s19  ;;  %p2891_p7 = scmp.ge.s32.totalorder %s4591_s27, 1 }
  0x12   : > { %s5708_s20 = scalar_select %p4730_p6, 1, 0 }
  0x13   : > { %p490_p8 = scmp.lt.s32.totalorder %s4591_s27, 3 }
  0x14   : > { %5709 = sst [smem:[#allocation13_spill]] %s5708_s20 }
  0x15   : > { %p491_p9 = pnand %p2891_p7, %p490_p8 }
  0x16   : > { %s5710_s23 = sld [smem:[#allocation15_spill]] (!%p491_p9)  ;;  %v2914_v2 = vld [vmem:[%s5674_s2 + $0x60] sm:$0xff] (!%p491_p9)  ;;  %p541_p10 = scmp.lt.s32.totalorder (!%p491_p9), %s4709_s28, 1  ;;  %v2915_v4 = vld [vmem:[%s5674_s2 + $0x68] sm:$0xff] (!%p491_p9)  ;;  %v2916_v9 = vld [vmem:[%s5674_s2 + $0x70] sm:$0xff] (!%p491_p9)  ;;  %vm591_vm0 = vcmask (!%p491_p9), 785408  }
  0x17   : > { %494 = sbr.rel (%p491_p9) target bundleno = 1818 (0x71a), region = 88  ;;  %v4049_v7 = vpack.c.bf16 (!%p491_p9), %v2915_v4, %v2914_v2  ;;  %v2917_v10 = vld [vmem:[%s5674_s2 + $0x78] sm:$0xff] (!%p491_p9)  ;;  %v2918_v14 = vld [vmem:[%s5674_s2 + $0x80] sm:$0xff] (!%p491_p9)  ;;  %v2919_v15 = vld [vmem:[%s5674_s2 + $0x88] sm:$0xff] (!%p491_p9)  ;;  %s5711_s0 = sld [smem:[#allocation14_spill]] (!%p491_p9)  ;;  %vm1210_vm1 = vcmask (!%p491_p9), 244736  }
  0x18   : > { %v4053_v12 = vpack.c.bf16 (!%p491_p9), %v2917_v10, %v2916_v9  ;;  %v4057_v17 = vpack.c.bf16 (!%p491_p9), %v2919_v15, %v2918_v14  ;;  %v2920_v20 = vld [vmem:[%s5674_s2 + $0x90] sm:$0xff] (!%p491_p9)  ;;  %v2921_v21 = vld [vmem:[%s5674_s2 + $0x98] sm:$0xff] (!%p491_p9)  ;;  %v2922_v27 = vld [vmem:[%s5674_s2 + $0xa0] sm:$0xff] (!%p491_p9)  ;;  %vm1217_vm2 = vcmask (!%p491_p9), 1045504   ;;  %vm4593_vm3 = vmmov (!%p491_p9), 1   ;;  %s539_s27 = sand.u32 (!%p491_p9), 1, %s4583_s25  }
  0x19   : > { %4050 = vmatprep.subr.bf16.mxu1 (!%p491_p9), %v4049_v7  ;;  %v4061_v24 = vpack.c.bf16 (!%p491_p9), %v2921_v21, %v2920_v20  ;;  %v2923_v28 = vld [vmem:[%s5674_s2 + $0xa8] sm:$0xff] (!%p491_p9)  ;;  %v2924_v33 = vld [vmem:[%s5674_s2 + $0xb0] sm:$0xff] (!%p491_p9)  ;;  %v2925_v34 = vld [vmem:[%s5674_s2 + $0xb8] sm:$0xff] (!%p491_p9)  ;;  %vm1383_vm5 = vcmask (!%p491_p9), 980992   ;;  %vm1381_vm6 = vcmask (!%p491_p9), 982016   ;;  %vm4595_vm7 = vmmov (!%p491_p9), 0  }
  0x1a   : > { %4052 = vmatpush3.bf16.msra.mxu1 (!%p491_p9), %v4049_v7  ;;  %v4065_v30 = vpack.c.bf16 (!%p491_p9), %v2923_v28, %v2922_v27  ;;  %v4069_v36 = vpack.c.bf16 (!%p491_p9), %v2925_v34, %v2924_v33  ;;  %v562_v39 = vld [vmem:[%s5674_s2] sm:$0xff] (!%p491_p9)  ;;  %v563_v40 = vld [vmem:[%s5674_s2 + $0x8] sm:$0xff] (!%p491_p9)  ;;  %v564_v45 = vld [vmem:[%s5674_s2 + $0x10] sm:$0xff] (!%p491_p9)  ;;  %vm1975_vm8 = vcmask (!%p491_p9), 1044480   ;;  %vm1971_vm10 = vcmask (!%p491_p9), 105472   ;;  %s5714_s22 = sld [smem:[#allocation16_spill]] (!%p491_p9) }
  0x1b   : > { %4054 = vmatprep.subr.bf16.mxu1 (!%p491_p9), %v4053_v12  ;;  %v4073_v42 = vpack.c.bf16 (!%p491_p9), %v563_v40, %v562_v39  ;;  %v565_v46 = vld [vmem:[%s5674_s2 + $0x18] sm:$0xff] (!%p491_p9)  ;;  %v566_v52 = vld [vmem:[%s5674_s2 + $0x20] sm:$0xff] (!%p491_p9)  ;;  %v567_v53 = vld [vmem:[%s5674_s2 + $0x28] sm:$0xff] (!%p491_p9)  ;;  %vm2124_vm11 = vcmask (!%p491_p9), 783360   ;;  %vm2396_vm12 = vcmask (!%p491_p9), 519168   ;;  %vm2408_vm13 = vcmask (!%p491_p9), 523264  }
  0x1c   : > { %v2894_v0 = vld [vmem:[%s5710_s23 + $0x60] sm:$0xff] (!%p491_p9)  ;;  %v2895_v1 = vld [vmem:[%s5710_s23 + $0x68] sm:$0xff] (!%p491_p9)  ;;  %v2896_v5 = vld [vmem:[%s5710_s23 + $0x70] sm:$0xff] (!%p491_p9)  ;;  %v4077_v49 = vpack.c.bf16 (!%p491_p9), %v565_v46, %v564_v45  ;;  %v4081_v57 = vpack.c.bf16 (!%p491_p9), %v567_v53, %v566_v52  ;;  %vm2818_vm14 = vcmask (!%p491_p9), 73728   ;;  %s5715_s18 = sld [smem:[#allocation17_spill]] (!%p491_p9) }
  0x1d   : > { %v4001_v3 = vpack.c.bf16 (!%p491_p9), %v2895_v1, %v2894_v0  ;;  %v2897_v6 = vld [vmem:[%s5710_s23 + $0x78] sm:$0xff] (!%p491_p9)  ;;  %v2898_v11 = vld [vmem:[%s5710_s23 + $0x80] sm:$0xff] (!%p491_p9)  ;;  %v2899_v13 = vld [vmem:[%s5710_s23 + $0x88] sm:$0xff] (!%p491_p9) }
  0x1e   : > { %v4005_v8 = vpack.c.bf16 %v2897_v6, %v2896_v5  ;;  %s542_s24 = scalar_select %p541_p10, %s4709_s28, 1  ;;  %v4009_v16 = vpack.c.bf16 %v2899_v13, %v2898_v11  ;;  %v2900_v18 = vld [vmem:[%s5710_s23 + $0x90] sm:$0xff]  ;;  %v2901_v19 = vld [vmem:[%s5710_s23 + $0x98] sm:$0xff]  ;;  %4056 = vmatpush3.bf16.msra.mxu1 %v4053_v12  ;;  %v2902_v25 = vld [vmem:[%s5710_s23 + $0xa0] sm:$0xff] }
  0x1f   : > { %4002 = vmatprep.subr.bf16.mxu0 %v4001_v3  ;;  %v4013_v23 = vpack.c.bf16 %v2901_v19, %v2900_v18  ;;  %4058 = vmatprep.subr.bf16.mxu1 %v4057_v17  ;;  %v2903_v26 = vld [vmem:[%s5710_s23 + $0xa8] sm:$0xff]  ;;  %v2904_v31 = vld [vmem:[%s5710_s23 + $0xb0] sm:$0xff]  ;;  %v2905_v32 = vld [vmem:[%s5710_s23 + $0xb8] sm:$0xff] }
  0x20   : > { %4004 = vmatpush3.bf16.msra.mxu0 %v4001_v3  ;;  %s3110_s19 = sshll.u32 %s542_s24, 5  ;;  %v4017_v29 = vpack.c.bf16 %v2903_v26, %v2902_v25  ;;  %v4021_v35 = vpack.c.bf16 %v2905_v32, %v2904_v31  ;;  %v550_v37 = vld [vmem:[%s5710_s23] sm:$0xff]  ;;  %v551_v38 = vld [vmem:[%s5710_s23 + $0x8] sm:$0xff]  ;;  %v552_v43 = vld [vmem:[%s5710_s23 + $0x10] sm:$0xff]  ;;  %s3107_s24 = sshll.u32 %s4709_s28, 4 }
  0x21   : > { %4006 = vmatprep.subr.bf16.mxu0 %v4005_v8  ;;  %s4777_s17 = scalar_lea.vmem %s5711_s0, %s3110_s19  ;;  %v4025_v41 = vpack.c.bf16 %v551_v38, %v550_v37  ;;  %v553_v44 = vld [vmem:[%s5710_s23 + $0x18] sm:$0xff]  ;;  %v554_v50 = vld [vmem:[%s5710_s23 + $0x20] sm:$0xff]  ;;  %v555_v51 = vld [vmem:[%s5710_s23 + $0x28] sm:$0xff]  ;;  %s2821_s0 = scalar_lea.sflag [#allocation6], %s539_s27 }
  0x22   : > { %v574_v22 = vld [vmem:[%s4777_s17 + $0x1] sm:$0xff]  ;;  %4060 = vmatpush3.bf16.msra.mxu1 %v4057_v17  ;;  %v575_v47 = vld [vmem:[%s4777_s17 + $0x9] sm:$0xff]  ;;  %v4029_v48 = vpack.c.bf16 %v553_v44, %v552_v43  ;;  %v576_v54 = vld [vmem:[%s4777_s17 + $0x11] sm:$0xff]  ;;  %v4033_v56 = vpack.c.bf16 %v555_v51, %v554_v50  ;;  %s5630_s26 = scalar_lea.hbm %s5715_s18, %s3107_s24  ;;  %s4597_s28 = smov [#allocation5]  }
  0x23   : > { %3435 = vmatprep.mubr.msk.f32.mxu0 %vm591_vm0, %v574_v22  ;;  %3495 = vmatprep.mubr.msk.f32.mxu1 %vm591_vm0, %v574_v22  ;;  %v577_v55 = vld [vmem:[%s4777_s17 + $0x19] sm:$0x3f]  ;;  %v556_v58 = vld [vmem:[%s5710_s23 + $0x30] sm:$0xff]  ;;  %v546_v62 = vld [vmem:[%s4777_s17] sm:$0xff]  ;;  %s4533_s20 = sshll.u32 %s4597_s28, 4  ;;  %s4534_s20 = int_to_ptr.vmem [resolvable:$false] %s4533_s20 }
  0x24   : > { %4008 = vmatpush3.bf16.msra.mxu0 %v4005_v8  ;;  %4062 = vmatprep.subr.bf16.mxu1 %v4061_v24  ;;  %v557_v59 = vld [vmem:[%s5710_s23 + $0x38] sm:$0xff]  ;;  %v568_v60 = vld [vmem:[%s5674_s2 + $0x30] sm:$0xff]  ;;  %v558_v1 = vld [vmem:[%s5710_s23 + $0x40] sm:$0xff]  ;;  %s4535_s21 = scalar_lea.vmem %s4534_s20, 32 }
  0x25   : > { %4010 = vmatprep.subr.bf16.mxu0 %v4009_v16  ;;  %v569_v61 = vld [vmem:[%s5674_s2 + $0x38] sm:$0xff]  ;;  %v4037_v63 = vpack.c.bf16 %v557_v59, %v556_v58  ;;  %v559_v2 = vld [vmem:[%s5710_s23 + $0x48] sm:$0xff]  ;;  %v570_v3 = vld [vmem:[%s5674_s2 + $0x40] sm:$0xff] }
  0x26   : > { %4064 = vmatpush3.bf16.msra.mxu1 %v4061_v24  ;;  %v4085_v0 = vpack.c.bf16 %v569_v61, %v568_v60  ;;  %v571_v4 = vld [vmem:[%s5674_s2 + $0x48] sm:$0xff]  ;;  %v4041_v5 = vpack.c.bf16 %v559_v2, %v558_v1  ;;  %v560_v7 = vld [vmem:[%s5710_s23 + $0x50] sm:$0xff]  ;;  %v561_v8 = vld [vmem:[%s5710_s23 + $0x58] sm:$0xff] }
  0x27   : > { %4066 = vmatprep.subr.bf16.mxu1 %v4065_v30  ;;  %v4089_v6 = vpack.c.bf16 %v571_v4, %v570_v3  ;;  %v572_v9 = vld [vmem:[%s5674_s2 + $0x50] sm:$0xff]  ;;  %v573_v10 = vld [vmem:[%s5674_s2 + $0x58] sm:$0xff]  ;;  %v4045_v11 = vpack.c.bf16 %v561_v8, %v560_v7  ;;  %v2934_v13 = vld [vmem:[%s5710_s23 + $0xc0] sm:$0xff] }
  0x28   : > { %4012 = vmatpush3.bf16.msra.mxu0 %v4009_v16  ;;  %v4093_v12 = vpack.c.bf16 %v573_v10, %v572_v9  ;;  %v2935_v14 = vld [vmem:[%s5710_s23 + $0xc8] sm:$0xff]  ;;  %v2950_v15 = vld [vmem:[%s5674_s2 + $0xc0] sm:$0xff]  ;;  %v2936_v19 = vld [vmem:[%s5710_s23 + $0xd0] sm:$0xff] }
  0x29   : > { %4014 = vmatprep.subr.bf16.mxu0 %v4013_v23  ;;  %v2951_v16 = vld [vmem:[%s5674_s2 + $0xc8] sm:$0xff]  ;;  %v4097_v17 = vpack.c.bf16 %v2935_v14, %v2934_v13  ;;  %v2937_v20 = vld [vmem:[%s5710_s23 + $0xd8] sm:$0xff]  ;;  %v2952_v21 = vld [vmem:[%s5674_s2 + $0xd0] sm:$0xff] }
  0x2a   : > { %4068 = vmatpush3.bf16.msra.mxu1 %v4065_v30  ;;  %v4121_v18 = vpack.c.bf16 %v2951_v16, %v2950_v15  ;;  %v2953_v22 = vld [vmem:[%s5674_s2 + $0xd8] sm:$0xff]  ;;  %v4101_v24 = vpack.c.bf16 %v2937_v20, %v2936_v19  ;;  %v2938_v26 = vld [vmem:[%s5710_s23 + $0xe0] sm:$0xff]  ;;  %v2939_v27 = vld [vmem:[%s5710_s23 + $0xe8] sm:$0xff] }
  0x2b   : > { %4070 = vmatprep.subr.bf16.mxu1 %v4069_v36  ;;  %v4125_v25 = vpack.c.bf16 %v2953_v22, %v2952_v21  ;;  %v2954_v28 = vld [vmem:[%s5674_s2 + $0xe0] sm:$0xff]  ;;  %v548_v30 = vld [vmem:[%s4777_s17 + $0x10] sm:$0xff]  ;;  %v549_v31 = vld [vmem:[%s4777_s17 + $0x18] sm:$0x3f]  ;;  %v4105_v32 = vpack.c.bf16 %v2939_v27, %v2938_v26 }
  0x2c   : > { %4016 = vmatpush3.bf16.msra.mxu0 %v4013_v23  ;;  %v547_v23 = vld [vmem:[%s4777_s17 + $0x8] sm:$0xff]  ;;  %v2940_v34 = vld [vmem:[%s5710_s23 + $0xf0] sm:$0xff]  ;;  %v2957_v37 = vld [vmem:[%s5674_s2 + $0xf8] sm:$0xff] }
  0x2d   : > { %4018 = vmatprep.subr.bf16.mxu0 %v4017_v29  ;;  %v969_v38 = vld [vmem:[%s4777_s17 + $0x2] sm:$0xff]  ;;  %v2961_v50 = vld [vmem:[%s5674_s2 + $0x118] sm:$0xff]  ;;  %v970_v53 = vld [vmem:[%s4777_s17 + $0xa] sm:$0xff] }
  0x2e   : > { %4072 = vmatpush3.bf16.msra.mxu1 %v4069_v36  ;;  %v2956_v36 = vld [vmem:[%s5674_s2 + $0xf0] sm:$0xff]  ;;  %v2958_v43 = vld [vmem:[%s5674_s2 + $0x100] sm:$0xff]  ;;  %v2959_v44 = vld [vmem:[%s5674_s2 + $0x108] sm:$0xff] }
  0x2f   : > { %4074 = vmatprep.subr.bf16.mxu1 %v4073_v42  ;;  %v4133_v40 = vpack.c.bf16 %v2957_v37, %v2956_v36  ;;  %v4137_v46 = vpack.c.bf16 %v2959_v44, %v2958_v43  ;;  %v2993_v58 = vld [vmem:[%s5679_s7 + $0x80] sm:$0xff]  ;;  %v2994_v60 = vld [vmem:[%s5679_s7 + $0x88] sm:$0xff]  ;;  %v2995_v61 = vld [vmem:[%s5679_s7 + $0x90] sm:$0xff] }
  0x30   : > { %4020 = vmatpush3.bf16.msra.mxu0 %v4017_v29  ;;  %v2955_v29 = vld [vmem:[%s5674_s2 + $0xe8] sm:$0xff]  ;;  %v2966_v4 = vld [vmem:[%s5675_s3] ss:$0 sm:$0xff]  ;;  %vm5021_vm4 = vmpackc.low %vm1217_vm2, %vm4593_vm3 }
  0x31   : > { %4022 = vmatprep.subr.bf16.mxu0 %v4021_v35  ;;  %3496 = vmatmul.mubr.msk.f32.vlgmr.msra.gmra.mrb[0].mxu1 %vm591_vm0, %v575_v47  ;;  %v4129_v33 = vpack.c.bf16 %v2955_v29, %v2954_v28  ;;  %v1209_v26 = vld [vmem:[%s5676_s4 + $0x8] sm:$0x7f]  ;;  %v1296_v27 = vld [vmem:[%s5677_s5] sm:$0xff]  ;;  %v2973_v28 = vld [vmem:[%s5678_s6 + $0x78] sm:$0xff] }
  0x32   : > { %4076 = vmatpush3.bf16.msra.mxu1 %v4073_v42  ;;  %3498 = vmatprep.mubr.msk.f32.mxu1 %vm591_vm0, %v576_v54  ;;  %v2943_v42 = vld [vmem:[%s5710_s23 + $0x108] sm:$0xff]  ;;  %v2974_v29 = vld [vmem:[%s5678_s6 + $0x80] sm:$0xff]  ;;  %v2981_v44 = vld [vmem:[%s5678_s6 + $0xb8] sm:$0xff] }
  0x33   : > { %4078 = vmatprep.subr.bf16.mxu1 %v4077_v49  ;;  %v2978_v36 = vld [vmem:[%s5678_s6 + $0xa0] sm:$0xff]  ;;  %vm4335_vm9 = vmpackc.low %vm1975_vm8, %vm4593_vm3 }
  0x34   : > { %4024 = vmatpush3.bf16.msra.mxu0 %v4021_v35  ;;  %v2941_v35 = vld [vmem:[%s5710_s23 + $0xf8] sm:$0xff] }
  0x35   : > { %4026 = vmatprep.subr.bf16.mxu0 %v4025_v41  ;;  %3499 = vmatmul.mubr.msk.f32.gmra.mrb[2].mxu1 %vm591_vm0, %v577_v55  ;;  %v4109_v39 = vpack.c.bf16 %v2941_v35, %v2940_v34  ;;  %v2977_v35 = vld [vmem:[%s5678_s6 + $0x98] sm:$0xff] }
  0x36   : > { %4080 = vmatpush3.bf16.msra.mxu1 %v4077_v49  ;;  %3525 = vmatprep.mubr.msk.f32.mxu1 %vm591_vm0, %v546_v62  ;;  %v2960_v49 = vld [vmem:[%s5674_s2 + $0x110] sm:$0xff]  ;;  %v4173_v37 = vpack.c.bf16 %v2978_v36, %v2977_v35  ;;  %v1410_v35 = vld [vmem:[%s5679_s7 + $0x40] sm:$0xff]  ;;  %v1411_v36 = vld [vmem:[%s5679_s7 + $0x48] sm:$0xff] }
  0x37   : > { %3436 = vmatmul.mubr.msk.f32.vlgmr.msra.gmra.mrb[0].mxu0 %vm591_vm0, %v575_v47  ;;  %4082 = vmatprep.subr.bf16.mxu1 %v4081_v57  ;;  %v2944_v47 = vld [vmem:[%s5710_s23 + $0x110] sm:$0xff]  ;;  %v4141_v52 = vpack.c.bf16 %v2961_v50, %v2960_v49  ;;  %v2983_v50 = vld [vmem:[%s5678_s6 + $0xc8] sm:$0xff] }
  0x38   : > { %4028 = vmatpush3.bf16.msra.mxu0 %v4025_v41  ;;  %3438 = vmatprep.mubr.msk.f32.mxu0 %vm591_vm0, %v576_v54  ;;  %v2942_v41 = vld [vmem:[%s5710_s23 + $0x100] sm:$0xff]  ;;  %v971_v54 = vld [vmem:[%s4777_s17 + $0x12] sm:$0xff] }
  0x39   : > { %4030 = vmatprep.subr.bf16.mxu0 %v4029_v48  ;;  %v4113_v45 = vpack.c.bf16 %v2943_v42, %v2942_v41  ;;  %v2999_v42 = vld [vmem:[%s5679_s7 + $0xb0] sm:$0xff] }
  0x3a   : > { %4084 = vmatpush3.bf16.msra.mxu1 %v4081_v57  ;;  %v2992_v57 = vld [vmem:[%s5679_s7 + $0x78] sm:$0xff] }
  0x3b   : > { %3439 = vmatmul.mubr.msk.f32.gmra.mrb[2].mxu0 %vm591_vm0, %v577_v55  ;;  %4086 = vmatprep.subr.bf16.mxu1 %v4085_v0  ;;  %v972_v55 = vld [vmem:[%s4777_s17 + $0x1a] sm:$0x3f]  ;;  %v4221_v59 = vpack.c.bf16 %v2993_v58, %v2992_v57  ;;  %v2986_v57 = vld [vmem:[%s5678_s6 + $0xe0] sm:$0xff]  ;;  %s540_s17 = scalar_lea.vmem [#allocation5], %s539_s27 }
  0x3c   : > { %4032 = vmatpush3.bf16.msra.mxu0 %v4029_v48  ;;  %3465 = vmatprep.mubr.msk.f32.mxu0 %vm591_vm0, %v546_v62  ;;  %v2945_v48 = vld [vmem:[%s5710_s23 + $0x118] sm:$0xff]  ;;  %v4225_v62 = vpack.c.bf16 %v2995_v61, %v2994_v60  ;;  %v3005_v60 = vld [vmem:[%s5679_s7 + $0xe0] sm:$0xff]  ;;  %s2833_s29 = sshll.u32 %s540_s17, 4  ;;  %s5632_s29 = int_to_ptr.vmem [resolvable:$true] %s2833_s29 }
  0x3d   : > { %4034 = vmatprep.subr.bf16.mxu0 %v4033_v56  ;;  %v4117_v51 = vpack.c.bf16 %v2945_v48, %v2944_v47  ;;  %v3001_v48 = vld [vmem:[%s5679_s7 + $0xc0] sm:$0xff]  ;;  %v3004_v58 = vld [vmem:[%s5679_s7 + $0xd8] sm:$0xff]  ;;  %s4529_s16 = scalar_lea.vmem %s5632_s29, 16  ;;  %p4536_p0 = scmp.lt.s32.totalorder %s5632_s29, %s4534_s20 }
  0x3e   : > { %4088 = vmatpush3.bf16.msra.mxu1 %v4085_v0  ;;  %v2997_v0 = vld [vmem:[%s5679_s7 + $0xa0] sm:$0xff]  ;;  %v4245_v61 = vpack.c.bf16 %v3005_v60, %v3004_v58  ;;  %v3014_v60 = vld [vmem:[%s5678_s6 + $0x108] sm:$0xff]  ;;  %p4530_p11 = scmp.ne.s32.totalorder %s5632_s29, %s4529_s16  ;;  %p4537_p1 = scmp.lt.s32.totalorder %s4535_s21, %s4529_s16 }
  0x3f   : > { %4090 = vmatprep.subr.bf16.mxu1 %v4089_v6 }
  0x40   : > { %4036 = vmatpush3.bf16.msra.mxu0 %v4033_v56  ;;  %v1208_v56 = vld [vmem:[%s5676_s4] sm:$0xff]  ;;  %p4531_p12 = pnand %p4530_p11, %p4726_p5  ;;  %p4538_p2 = por %p4537_p1, %p4536_p0 }
  0x41   : > { %4038 = vmatprep.subr.bf16.mxu0 %v4037_v63 }
  0x42   : > { %4092 = vmatpush3.bf16.msra.mxu1 %v4089_v6  ;;  %p4532_p13 = pneg %p4531_p12 }
  0x43   : > { %4094 = vmatprep.subr.bf16.mxu1 %v4093_v12 }
  0x44   : > { %4040 = vmatpush3.bf16.msra.mxu0 %v4037_v63  ;;  %v2996_v63 = vld [vmem:[%s5679_s7 + $0x98] sm:$0xff]  ;;  %p4539_p3 = pnand %p4538_p2, %p4532_p13 }
  0x45   : > { %4042 = vmatprep.subr.bf16.mxu0 %v4041_v5  ;;  %v4229_v1 = vpack.c.bf16 %v2997_v0, %v2996_v63  ;;  %v3006_v63 = vld [vmem:[%s5679_s7 + $0xe8] sm:$0xff]  ;;  %v1387_v0 = vld [vmem:[%s5678_s6] sm:$0xff] }
  0x46   : > { %4096 = vmatpush3.bf16.msra.mxu1 %v4093_v12 }
  0x47   : > { %4122 = vmatprep.subr.bf16.mxu1 %v4121_v18 }
  0x48   : > { %4044 = vmatpush3.bf16.msra.mxu0 %v4041_v5 }
  0x49   : > { %4046 = vmatprep.subr.bf16.mxu0 %v4045_v11  ;;  %3526 = vmatmul.mubr.msk.f32.vlgmr.msra.gmra.mrb[0].mxu1 %vm591_vm0, %v547_v23 }
  0x4a   : > { %4124 = vmatpush3.bf16.msra.mxu1 %v4121_v18  ;;  %3528 = vmatprep.mubr.msk.f32.mxu1 %vm591_vm0, %v548_v30 }
  0x4b   : > { %4126 = vmatprep.subr.bf16.mxu1 %v4125_v25 }
  0x4c   : > { %4048 = vmatpush3.bf16.msra.mxu0 %v4045_v11 }
  0x4d   : > { %4098 = vmatprep.subr.bf16.mxu0 %v4097_v17  ;;  %3529 = vmatmul.mubr.msk.f32.gmra.mrb[2].mxu1 %vm591_vm0, %v549_v31 }
  0x4e   : > { %4128 = vmatpush3.bf16.msra.mxu1 %v4125_v25  ;;  %3585 = vmatprep.mubr.msk.f32.mxu1 %vm591_vm0, %v969_v38 }
  0x4f   : > { %3466 = vmatmul.mubr.msk.f32.vlgmr.msra.gmra.mrb[0].mxu0 %vm591_vm0, %v547_v23  ;;  %4130 = vmatprep.subr.bf16.mxu1 %v4129_v33 }
  0x50   : > { %4100 = vmatpush3.bf16.msra.mxu0 %v4097_v17  ;;  %3468 = vmatprep.mubr.msk.f32.mxu0 %vm591_vm0, %v548_v30  ;;  %v4165_v30 = vpack.c.bf16 %v2974_v29, %v2973_v28  ;;  %v1394_v28 = vld [vmem:[%s5678_s6 + $0x38] sm:$0xff]  ;;  %v1408_v29 = vld [vmem:[%s5679_s7 + $0x30] sm:$0xff] }
  0x51   : > { %4102 = vmatprep.subr.bf16.mxu0 %v4101_v24 }
  0x52   : > { %4132 = vmatpush3.bf16.msra.mxu1 %v4129_v33  ;;  %v1297_v33 = vld [vmem:[%s5677_s5 + $0x8] sm:$0x7f] }
  0x53   : > { %3469 = vmatmul.mubr.msk.f32.gmra.mrb[2].mxu0 %vm591_vm0, %v549_v31  ;;  %4134 = vmatprep.subr.bf16.mxu1 %v4133_v40  ;;  %v2975_v31 = vld [vmem:[%s5678_s6 + $0x88] sm:$0xff] }
  0x54   : > { %4104 = vmatpush3.bf16.msra.mxu0 %v4101_v24  ;;  %3555 = vmatprep.mubr.msk.f32.mxu0 %vm591_vm0, %v969_v38  ;;  %v2979_v38 = vld [vmem:[%s5678_s6 + $0xa8] sm:$0xff] }
  0x55   : > { %4106 = vmatprep.subr.bf16.mxu0 %v4105_v32 }
  0x56   : > { %4136 = vmatpush3.bf16.msra.mxu1 %v4133_v40  ;;  %v2998_v40 = vld [vmem:[%s5679_s7 + $0xa8] sm:$0xff] }
  0x57   : > { %4138 = vmatprep.subr.bf16.mxu1 %v4137_v46  ;;  %v4233_v43 = vpack.c.bf16 %v2999_v42, %v2998_v40  ;;  %v1398_v40 = vld [vmem:[%s5678_s6 + $0x58] sm:$0xff] }
  0x58   : > { %4108 = vmatpush3.bf16.msra.mxu0 %v4105_v32  ;;  %v2976_v32 = vld [vmem:[%s5678_s6 + $0x90] sm:$0xff]  ;;  %v1413_v42 = vld [vmem:[%s5679_s7 + $0x58] sm:$0xff] }
  0x59   : > { %4110 = vmatprep.subr.bf16.mxu0 %v4109_v39  ;;  %v4169_v34 = vpack.c.bf16 %v2976_v32, %v2975_v31 }
  0x5a   : > { %4140 = vmatpush3.bf16.msra.mxu1 %v4137_v46  ;;  %v3000_v46 = vld [vmem:[%s5679_s7 + $0xb8] sm:$0xff] }
  0x5b   : > { %4142 = vmatprep.subr.bf16.mxu1 %v4141_v52  ;;  %v4237_v49 = vpack.c.bf16 %v3001_v48, %v3000_v46  ;;  %v1400_v46 = vld [vmem:[%s5678_s6 + $0x68] sm:$0xff] }
  0x5c   : > { %4112 = vmatpush3.bf16.msra.mxu0 %v4109_v39  ;;  %v2980_v39 = vld [vmem:[%s5678_s6 + $0xb0] sm:$0xff]  ;;  %v1415_v48 = vld [vmem:[%s5679_s7 + $0x68] sm:$0xff] }
  0x5d   : > { %4114 = vmatprep.subr.bf16.mxu0 %v4113_v45  ;;  %v4177_v41 = vpack.c.bf16 %v2980_v39, %v2979_v38  ;;  %v4265_v38 = vpack.c.bf16 %v1411_v36, %v1410_v35  ;;  %v1397_v39 = vld [vmem:[%s5678_s6 + $0x50] sm:$0xff]  ;;  %v4594_v36 = vmov 0.0|0.0  }
  0x5e   : > { %4144 = vmatpush3.bf16.msra.mxu1 %v4141_v52  ;;  %v3002_v52 = vld [vmem:[%s5679_s7 + $0xc8] sm:$0xff] }
  0x5f   : > { %4222 = vmatprep.subr.bf16.mxu1 %v4221_v59 }
  0x60   : > { %4116 = vmatpush3.bf16.msra.mxu0 %v4113_v45  ;;  %v2982_v45 = vld [vmem:[%s5678_s6 + $0xc0] sm:$0xff] }
  0x61   : > { %4118 = vmatprep.subr.bf16.mxu0 %v4117_v51  ;;  %3586 = vmatmul.mubr.msk.f32.vlgmr.msra.gmra.mrb[0].mxu1 %vm591_vm0, %v970_v53  ;;  %v4181_v47 = vpack.c.bf16 %v2982_v45, %v2981_v44  ;;  %v1399_v45 = vld [vmem:[%s5678_s6 + $0x60] sm:$0xff] }
  0x62   : > { %3588 = vmatprep.mubr.msk.f32.mxu1 %vm591_vm0, %v971_v54  ;;  %4224 = vmatpush3.bf16.msra.mxu1 %v4221_v59 }
  0x63   : > { %4226 = vmatprep.subr.bf16.mxu1 %v4225_v62 }
  0x64   : > { %4120 = vmatpush3.bf16.msra.mxu0 %v4117_v51  ;;  %v2984_v51 = vld [vmem:[%s5678_s6 + $0xd0] sm:$0xff] }
  0x65   : > { %3589 = vmatmul.mubr.msk.f32.gmra.mrb[2].mxu1 %vm591_vm0, %v972_v55 }
  0x66   : > { %4228 = vmatpush3.bf16.msra.mxu1 %v4225_v62  ;;  %v2987_v62 = vld [vmem:[%s5678_s6 + $0xe8] sm:$0xff] }
  0x67   : > { %3556 = vmatmul.mubr.msk.f32.vlgmr.msra.gmra.mrb[0].mxu0 %vm591_vm0, %v970_v53  ;;  %4230 = vmatprep.subr.bf16.mxu1 %v4229_v1  ;;  %v4185_v53 = vpack.c.bf16 %v2984_v51, %v2983_v50  ;;  %v1401_v51 = vld [vmem:[%s5678_s6 + $0x70] sm:$0xff] }
  0x68   : > { %3558 = vmatprep.mubr.msk.f32.mxu0 %vm591_vm0, %v971_v54  ;;  %v3003_v54 = vld [vmem:[%s5679_s7 + $0xd0] sm:$0xff] }
  0x6a   : > { %4232 = vmatpush3.bf16.msra.mxu1 %v4229_v1  ;;  %v1388_v1 = vld [vmem:[%s5678_s6 + $0x8] sm:$0xff] }
  0x6b   : > { %3559 = vmatmul.mubr.msk.f32.gmra.mrb[2].mxu0 %vm591_vm0, %v972_v55  ;;  %4234 = vmatprep.subr.bf16.mxu1 %v4233_v43  ;;  %v4241_v55 = vpack.c.bf16 %v3003_v54, %v3002_v52  ;;  %v1416_v52 = vld [vmem:[%s5679_s7 + $0x70] sm:$0xff]  ;;  %v3012_v54 = vld [vmem:[%s5678_s6 + $0xf8] sm:$0xff] }
  0x6c   : > { %3599 = vmatprep.mubr.msk.f32.mxu0 %vm1210_vm1, %v1208_v56  ;;  %v2985_v56 = vld [vmem:[%s5678_s6 + $0xd8] sm:$0xff] }
  0x6d   : > { %v4189_v59 = vpack.c.bf16 %v2986_v57, %v2985_v56  ;;  %v3029_v56 = vld [vmem:[%s5679_s7 + $0xf8] sm:$0xff]  ;;  %v3013_v57 = vld [vmem:[%s5678_s6 + $0x100] sm:$0xff] }
  0x6e   : > { %4236 = vmatpush3.bf16.msra.mxu1 %v4233_v43  ;;  %v4213_v43 = vpack.c.bf16 %v1398_v40, %v1397_v39  ;;  %v2128_v39 = vld [vmem:[%s5683_s11 + $0x8] sm:$0xff] }
  0x6f   : > { %4238 = vmatprep.subr.bf16.mxu1 %v4237_v49 }
  0x72   : > { %4240 = vmatpush3.bf16.msra.mxu1 %v4237_v49  ;;  %v4217_v49 = vpack.c.bf16 %v1400_v46, %v1399_v45  ;;  %v3045_v46 = vld [vmem:[%s5680_s8] ss:$0 sm:$0xff] }
  0x73   : > { %4242 = vmatprep.subr.bf16.mxu1 %v4241_v55 }
  0x76   : > { %4244 = vmatpush3.bf16.msra.mxu1 %v4241_v55  ;;  %v3028_v55 = vld [vmem:[%s5679_s7 + $0xf0] sm:$0xff] }
  0x77   : > { %4246 = vmatprep.subr.bf16.mxu1 %v4245_v61 }
  0x7a   : > { %4248 = vmatpush3.bf16.msra.mxu1 %v4245_v61  ;;  %v3030_v61 = vld [vmem:[%s5679_s7 + $0x100] sm:$0xff] }
  0x7b   : > { %3707 = vmatprep.subr.mxu1 %v3006_v63 }
  0x7e   : > { %3708 = vmatpush3.msra.mxu1 %v3006_v63 }
 0x134   : > { %v3587_v3 = vpop.f32.mrb[0].mxu1 }
 0x135   : > { %v1166_v7 = vpop.f32.mrb[1].mxu1 }
 0x138   : > { %v3590_v12 = vpop.f32.mrb[2].mxu1 }
 0x139   : > { %v1176_v16 = vpop.f32.mrb[3].mxu1 }
 0x13a   : > { %v3557_v2 = vpop.f32.mrb[0].mxu0 }
 0x13b   : > { %v1064_v5 = vpop.f32.mrb[1].mxu0  ;;  %v1190_v6 = vmax.f32 %v3557_v2, %v3587_v3  ;;  %v1402_v2 = vld [vmem:[%s5679_s7] sm:$0xff]  ;;  %v4193_v3 = vpack.c.bf16 %v1388_v1, %v1387_v0  ;;  %v4281_v0 = vpack.c.bf16 %v3014_v60, %v3013_v57 }
 0x13c   : > { %v1189_v8 = vmax.f32 %v1064_v5, %v1166_v7  ;;  %v3050_v57 = vld [vmem:[%s5683_s11 + $0x60] sm:$0xff] }
 0x13d   : > { %v1201_v9 = vadd.f32 %v2966_v4, %v1190_v6 }
 0x13e   : > { %v3560_v10 = vpop.f32.mrb[2].mxu0  ;;  %v1200_v11 = vadd.f32 %v2966_v4, %v1189_v8 }
 0x13f   : > { %v1074_v13 = vpop.f32.mrb[3].mxu0  ;;  %v1205_v14 = vmax.f32 %v1201_v9, 0.0  ;;  %v1192_v15 = vmax.f32 %v3560_v10, %v3590_v12  ;;  %v1389_v12 = vld [vmem:[%s5678_s6 + $0x10] sm:$0xff] }
 0x140   : > { %v1204_v17 = vmax.f32 %v1200_v11, 0.0  ;;  %v1191_v18 = vmax.f32 %v1074_v13, %v1176_v16  ;;  %v1390_v13 = vld [vmem:[%s5678_s6 + $0x18] sm:$0xff] }
 0x141   : > { %v1203_v19 = vadd.f32 %v2966_v4, %v1192_v15  ;;  %v1405_v15 = vld [vmem:[%s5679_s7 + $0x18] sm:$0xff] }
 0x142   : > { %v4145_v20 = vpack.c.bf16 %v1205_v14, %v1204_v17  ;;  %v1202_v21 = vadd.f32 %v2966_v4, %v1191_v18  ;;  %v1403_v4 = vld [vmem:[%s5679_s7 + $0x8] sm:$0xff]  ;;  %v1404_v14 = vld [vmem:[%s5679_s7 + $0x10] sm:$0xff]  ;;  %v1391_v17 = vld [vmem:[%s5678_s6 + $0x20] sm:$0xff] }
 0x143   : > { %v1207_v22 = vmax.f32 %v1203_v19, 0.0  ;;  %v4249_v5 = vpack.c.bf16 %v1403_v4, %v1402_v2  ;;  %v1392_v18 = vld [vmem:[%s5678_s6 + $0x28] sm:$0xff]  ;;  %v3015_v2 = vld [vmem:[%s5678_s6 + $0x110] sm:$0xff] }
 0x144   : > { %v1206_v23 = vmax.f32 %v1202_v21, 0.0  ;;  %4146 = vmatprep.subr.bf16.mxu0 %v4145_v20  ;;  %v4253_v21 = vpack.c.bf16 %v1405_v15, %v1404_v14  ;;  %v3019_v15 = vld [vmem:[%s5678_s6 + $0x130] sm:$0xff] }
 0x145   : > { %4148 = vmatpush3.bf16.msra.mxu0 %v4145_v20  ;;  %4250 = vmatprep.subr.bf16.mxu1 %v4249_v5 }
 0x146   : > { %v4149_v25 = vpack.c.bf16 %v1207_v22, %v1206_v23  ;;  %v1406_v22 = vld [vmem:[%s5679_s7 + $0x20] sm:$0xff]  ;;  %v1407_v23 = vld [vmem:[%s5679_s7 + $0x28] sm:$0xff] }
 0x148   : > { %4151 = vmatprep.subr.msk.bf16.mxu0 %vm5021_vm4, %v4149_v25 }
 0x149   : > { %4154 = vmatpush3.bf16.msk.msra.mxu0 %vm5021_vm4, %v4149_v25 }
 0x14a   : > { %4156 = vmatprep.subr.bf16.mxu0 %v4145_v20 }
 0x14c   : > { %3600 = vmatmul.mubr.msk.f32.vlgmr.msra.gmra.mrb[4].mxu0 %vm1210_vm1, %v1209_v26  ;;  %v4257_v26 = vpack.c.bf16 %v1407_v23, %v1406_v22  ;;  %v3022_v22 = vld [vmem:[%s5678_s6 + $0x148] sm:$0xff]  ;;  %v3038_v23 = vld [vmem:[%s5679_s7 + $0x140] sm:$0xff] }
 0x14d   : > { %4158 = vmatpush3.bf16.msra.mxu0 %v4145_v20  ;;  %3610 = vmatprep.mubr.msk.f32.mxu0 %vm1210_vm1, %v1296_v27  ;;  %v4197_v20 = vpack.c.bf16 %v1390_v13, %v1389_v12  ;;  %v1393_v27 = vld [vmem:[%s5678_s6 + $0x30] sm:$0xff]  ;;  %v3035_v12 = vld [vmem:[%s5679_s7 + $0x128] sm:$0xff] }
 0x14e   : > { %4161 = vmatprep.subr.msk.bf16.mxu0 %vm5021_vm4, %v4149_v25  ;;  %v4205_v31 = vpack.c.bf16 %v1394_v28, %v1393_v27  ;;  %v3023_v27 = vld [vmem:[%s5678_s6 + $0x150] sm:$0xff]  ;;  %v3024_v28 = vld [vmem:[%s5678_s6 + $0x158] sm:$0xff] }
 0x151   : > { %4164 = vmatpush3.bf16.msk.msra.mxu0 %vm5021_vm4, %v4149_v25  ;;  %v4201_v25 = vpack.c.bf16 %v1392_v18, %v1391_v17  ;;  %v3036_v17 = vld [vmem:[%s5679_s7 + $0x130] sm:$0xff]  ;;  %v3037_v18 = vld [vmem:[%s5679_s7 + $0x138] sm:$0xff] }
 0x152   : > { %4166 = vmatprep.subr.bf16.mxu0 %v4165_v30 }
 0x154   : > { %3611 = vmatmul.mubr.msk.f32.vlgmr.msra.gmra.mrb[6].mxu0 %vm1210_vm1, %v1297_v33  ;;  %v1395_v33 = vld [vmem:[%s5678_s6 + $0x40] sm:$0xff] }
 0x155   : > { %4168 = vmatpush3.bf16.msra.mxu0 %v4165_v30  ;;  %v1409_v30 = vld [vmem:[%s5679_s7 + $0x38] sm:$0xff] }
 0x156   : > { %4170 = vmatprep.subr.bf16.mxu0 %v4169_v34  ;;  %v4261_v32 = vpack.c.bf16 %v1409_v30, %v1408_v29  ;;  %v3040_v29 = vld [vmem:[%s5679_s7 + $0x150] sm:$0xff]  ;;  %v3041_v30 = vld [vmem:[%s5679_s7 + $0x158] sm:$0xff] }
 0x159   : > { %4172 = vmatpush3.bf16.msra.mxu0 %v4169_v34  ;;  %v1396_v34 = vld [vmem:[%s5678_s6 + $0x48] sm:$0xff] }
 0x15a   : > { %4174 = vmatprep.subr.bf16.mxu0 %v4173_v37 }
 0x15d   : > { %4176 = vmatpush3.bf16.msra.mxu0 %v4173_v37  ;;  %v4209_v37 = vpack.c.bf16 %v1396_v34, %v1395_v33  ;;  %v3025_v33 = vld [vmem:[%s5678_s6 + $0x160] sm:$0xff] }
 0x15e   : > { %4178 = vmatprep.subr.bf16.mxu0 %v4177_v41  ;;  %v3042_v34 = vld [vmem:[%s5679_s7 + $0x160] sm:$0xff] }
 0x161   : > { %4180 = vmatpush3.bf16.msra.mxu0 %v4177_v41  ;;  %v1412_v41 = vld [vmem:[%s5679_s7 + $0x50] sm:$0xff] }
 0x162   : > { %4182 = vmatprep.subr.bf16.mxu0 %v4181_v47  ;;  %v4269_v44 = vpack.c.bf16 %v1413_v42, %v1412_v41  ;;  %v2129_v41 = vld [vmem:[%s5683_s11 + $0x10] sm:$0xff]  ;;  %v2130_v42 = vld [vmem:[%s5683_s11 + $0x18] sm:$0xff] }
 0x165   : > { %4184 = vmatpush3.bf16.msra.mxu0 %v4181_v47  ;;  %v1414_v47 = vld [vmem:[%s5679_s7 + $0x60] sm:$0xff] }
 0x166   : > { %4186 = vmatprep.subr.bf16.mxu0 %v4185_v53  ;;  %v4273_v50 = vpack.c.bf16 %v1415_v48, %v1414_v47 }
 0x169   : > { %4188 = vmatpush3.bf16.msra.mxu0 %v4185_v53  ;;  %v3011_v53 = vld [vmem:[%s5678_s6 + $0xf0] sm:$0xff] }
 0x16a   : > { %4190 = vmatprep.subr.bf16.mxu0 %v4189_v59  ;;  %v4277_v58 = vpack.c.bf16 %v3012_v54, %v3011_v53 }
 0x16d   : > { %4192 = vmatpush3.bf16.msra.mxu0 %v4189_v59  ;;  %v4305_v59 = vpack.c.bf16 %v3029_v56, %v3028_v55  ;;  %v1970_v56 = vld [vmem:[%s5681_s9] sm:$0x3f] }
 0x16e   : > { %3641 = vmatprep.subr.mxu0 %v2987_v62 }
 0x171   : > { %3642 = vmatpush3.msra.mxu0 %v2987_v62  ;;  %v3031_v62 = vld [vmem:[%s5679_s7 + $0x108] sm:$0xff] }
 0x172   : > { %4194 = vmatprep.subr.bf16.mxu0 %v4193_v3  ;;  %v4309_v1 = vpack.c.bf16 %v3031_v62, %v3030_v61  ;;  %v3052_v61 = vld [vmem:[%s5683_s11 + $0x70] sm:$0xff]  ;;  %v3053_v62 = vld [vmem:[%s5683_s11 + $0x78] sm:$0xff] }
 0x21f   : > { %v3601_v6 = vpop.f32.mrb[4].mxu0 }
 0x220   : > { %v1287_v7 = vpop.f32.mrb[5].mxu0 }
 0x227   : > { %v3612_v8 = vpop.f32.mrb[6].mxu0 }
 0x228   : > { %v1380_v9 = vmax.f32 %v3601_v6, %v3612_v8  ;;  %v1370_v10 = vpop.f32.mrb[7].mxu0  ;;  %v3033_v6 = vld [vmem:[%s5679_s7 + $0x118] sm:$0xff] }
 0x229   : > { %v1379_v11 = vmax.f32 %v1287_v7, %v1370_v10  ;;  %v3018_v10 = vld [vmem:[%s5678_s6 + $0x128] sm:$0xff] }
 0x22a   : > { %1384 = vst.msk [vmem:[#allocation2 + $0x8] sm:$0x7f] %vm1383_vm5, %v1380_v9  ;;  %v3017_v9 = vld [vmem:[%s5678_s6 + $0x120] sm:$0xff] }
 0x22b   : > { %1382 = vst.msk [vmem:[#allocation2] sm:$0xff] %vm1381_vm6, %v1379_v11  ;;  %v3034_v11 = vld [vmem:[%s5679_s7 + $0x120] sm:$0xff]  ;;  %v4289_v13 = vpack.c.bf16 %v3018_v10, %v3017_v9  ;;  %v2133_v9 = vld [vmem:[%s5683_s11 + $0x30] sm:$0xff]  ;;  %v2134_v10 = vld [vmem:[%s5683_s11 + $0x38] sm:$0xff] }
 0x22c   : > { %v4317_v14 = vpack.c.bf16 %v3035_v12, %v3034_v11  ;;  %v4369_v11 = vpack.c.bf16 %v2134_v10, %v2133_v9  ;;  %v3058_v12 = vld [vmem:[%s5683_s11 + $0xa0] sm:$0xff] }
 0x231   : > { %v1418_v19 = vld [vmem:[#allocation2 + $0x9] sm:$0x1f] }
 0x232   : > { %v1417_v16 = vld [vmem:[#allocation2 + $0x1] sm:$0xff]  ;;  %v1764_v35 = vld [vmem:[#allocation2 + $0xa] sm:$0x1f] }
 0x233   : > { %3643 = vmatprep.mubr.msk.f32.mxu0 %vm1381_vm6, %v1417_v16  ;;  %3709 = vmatprep.mubr.msk.f32.mxu1 %vm1381_vm6, %v1417_v16  ;;  %v1385_v24 = vld [vmem:[#allocation2] sm:$0xff]  ;;  %v1386_v63 = vld [vmem:[#allocation2 + $0x8] sm:$0x1f]  ;;  %v3020_v16 = vld [vmem:[%s5678_s6 + $0x138] sm:$0xff] }
 0x234   : > { %3644 = vmatmul.mubr.msk.f32.vlgmr.msra.gmra.mrb[8].mxu0 %vm1381_vm6, %v1418_v19  ;;  %3710 = vmatmul.mubr.msk.f32.vlgmr.msra.gmra.mrb[4].mxu1 %vm1381_vm6, %v1418_v19  ;;  %v1763_v4 = vld [vmem:[#allocation2 + $0x2] sm:$0xff]  ;;  %v4293_v19 = vpack.c.bf16 %v3020_v16, %v3019_v15 }
 0x235   : > { %4196 = vmatpush3.bf16.msra.mxu0 %v4193_v3  ;;  %4252 = vmatpush3.bf16.msra.mxu1 %v4249_v5  ;;  %v3016_v3 = vld [vmem:[%s5678_s6 + $0x118] sm:$0xff]  ;;  %v3032_v5 = vld [vmem:[%s5679_s7 + $0x110] sm:$0xff]  ;;  %v2135_v15 = vld [vmem:[%s5683_s11 + $0x40] sm:$0xff] }
 0x236   : > { %3676 = vmatprep.mubr.msk.f32.mxu0 %vm1381_vm6, %v1385_v24  ;;  %3742 = vmatprep.mubr.msk.f32.mxu1 %vm1381_vm6, %v1385_v24  ;;  %v4285_v7 = vpack.c.bf16 %v3016_v3, %v3015_v2  ;;  %v4313_v8 = vpack.c.bf16 %v3033_v6, %v3032_v5  ;;  %v3039_v24 = vld [vmem:[%s5679_s7 + $0x148] sm:$0xff]  ;;  %v2131_v3 = vld [vmem:[%s5683_s11 + $0x20] sm:$0xff]  ;;  %v3056_v6 = vld [vmem:[%s5683_s11 + $0x90] sm:$0xff] }
 0x237   : > { %4198 = vmatprep.subr.bf16.mxu0 %v4197_v20  ;;  %4254 = vmatprep.subr.bf16.mxu1 %v4253_v21  ;;  %v2136_v16 = vld [vmem:[%s5683_s11 + $0x48] sm:$0xff] }
 0x239   : > { %4200 = vmatpush3.bf16.msra.mxu0 %v4197_v20  ;;  %4256 = vmatpush3.bf16.msra.mxu1 %v4253_v21  ;;  %v4321_v20 = vpack.c.bf16 %v3037_v18, %v3036_v17  ;;  %v3021_v21 = vld [vmem:[%s5678_s6 + $0x140] sm:$0xff]  ;;  %v4372_v17 = vpack.c.bf16 %v2136_v16, %v2135_v15  ;;  %v3060_v18 = vld [vmem:[%s5683_s11 + $0xb0] sm:$0xff] }
 0x23a   : > { %4202 = vmatprep.subr.bf16.mxu0 %v4201_v25  ;;  %4258 = vmatprep.subr.bf16.mxu1 %v4257_v26  ;;  %v3077_v15 = vld [vmem:[%s5684_s12] ss:$0 sm:$0xff] }
 0x23d   : > { %4204 = vmatpush3.bf16.msra.mxu0 %v4201_v25  ;;  %4260 = vmatpush3.bf16.msra.mxu1 %v4257_v26  ;;  %v4297_v25 = vpack.c.bf16 %v3022_v22, %v3021_v21  ;;  %v4325_v26 = vpack.c.bf16 %v3039_v24, %v3038_v23  ;;  %v2138_v22 = vld [vmem:[%s5683_s11 + $0x58] sm:$0xff] }
 0x23e   : > { %4206 = vmatprep.subr.bf16.mxu0 %v4205_v31  ;;  %4262 = vmatprep.subr.bf16.mxu1 %v4261_v32 }
 0x241   : > { %4208 = vmatpush3.bf16.msra.mxu0 %v4205_v31  ;;  %4264 = vmatpush3.bf16.msra.mxu1 %v4261_v32  ;;  %v4301_v31 = vpack.c.bf16 %v3024_v28, %v3023_v27  ;;  %v4329_v32 = vpack.c.bf16 %v3041_v30, %v3040_v29  ;;  %v3064_v29 = vld [vmem:[%s5683_s11 + $0xc0] sm:$0xff]  ;;  %v3065_v30 = vld [vmem:[%s5683_s11 + $0xc8] sm:$0xff] }
 0x242   : > { %4210 = vmatprep.subr.bf16.mxu0 %v4209_v37  ;;  %4266 = vmatprep.subr.bf16.mxu1 %v4265_v38 }
 0x245   : > { %4212 = vmatpush3.bf16.msra.mxu0 %v4209_v37  ;;  %4268 = vmatpush3.bf16.msra.mxu1 %v4265_v38  ;;  %v4596_v37 = vmov 0.0   ;;  %v2127_v38 = vld [vmem:[%s5683_s11] sm:$0xff] }
 0x246   : > { %4214 = vmatprep.subr.bf16.mxu0 %v4213_v43  ;;  %4270 = vmatprep.subr.bf16.mxu1 %v4269_v44  ;;  %v4360_v40 = vpack.c.bf16 %v2128_v39, %v2127_v38  ;;  %v3068_v39 = vld [vmem:[%s5683_s11 + $0xe0] sm:$0xff] }
 0x249   : > { %4216 = vmatpush3.bf16.msra.mxu0 %v4213_v43  ;;  %4272 = vmatpush3.bf16.msra.mxu1 %v4269_v44  ;;  %v4363_v43 = vpack.c.bf16 %v2130_v42, %v2129_v41  ;;  %v3070_v42 = vld [vmem:[%s5683_s11 + $0xf0] sm:$0xff] }
 0x24a   : > { %4218 = vmatprep.subr.bf16.mxu0 %v4217_v49  ;;  %4274 = vmatprep.subr.bf16.mxu1 %v4273_v50 }
 0x24d   : > { %4220 = vmatpush3.bf16.msra.mxu0 %v4217_v49  ;;  %4276 = vmatpush3.bf16.msra.mxu1 %v4273_v50 }
 0x24e   : > { %3674 = vmatprep.subr.mxu0 %v1401_v51  ;;  %3740 = vmatprep.subr.mxu1 %v1416_v52 }
 0x251   : > { %3675 = vmatpush3.msra.mxu0 %v1401_v51  ;;  %3741 = vmatpush3.msra.mxu1 %v1416_v52 }
 0x252   : > { %3677 = vmatmul.mubr.msk.f32.vlgmr.msra.gmra.mrb[8].mxu0 %vm1381_vm6, %v1386_v63  ;;  %3743 = vmatmul.mubr.msk.f32.vlgmr.msra.gmra.mrb[4].mxu1 %vm1381_vm6, %v1386_v63  ;;  %v4345_v63 = vpack.c.bf16 %v3053_v62, %v3052_v61  ;;  %v2406_v61 = vld [vmem:[%s5685_s13 + $0x30] sm:$0xff]  ;;  %v2407_v62 = vld [vmem:[%s5685_s13 + $0x38] sm:$0xff] }
 0x253   : > { %4278 = vmatprep.subr.bf16.mxu0 %v4277_v58  ;;  %4306 = vmatprep.subr.bf16.mxu1 %v4305_v59 }
 0x254   : > { %4280 = vmatpush3.bf16.msra.mxu0 %v4277_v58  ;;  %3775 = vmatprep.mubr.msk.f32.mxu0 %vm1381_vm6, %v1763_v4  ;;  %v3051_v58 = vld [vmem:[%s5683_s11 + $0x68] sm:$0xff] }
 0x255   : > { %4308 = vmatpush3.bf16.msra.mxu1 %v4305_v59  ;;  %3808 = vmatprep.mubr.msk.f32.mxu1 %vm1381_vm6, %v1763_v4  ;;  %v2049_v59 = vld [vmem:[%s5682_s10] sm:$0x3f]  ;;  %v4342_v60 = vpack.c.bf16 %v3051_v58, %v3050_v57  ;;  %v2132_v4 = vld [vmem:[%s5683_s11 + $0x28] sm:$0xff] }
 0x256   : > { %4282 = vmatprep.subr.bf16.mxu0 %v4281_v0  ;;  %4310 = vmatprep.subr.bf16.mxu1 %v4309_v1  ;;  %v4366_v5 = vpack.c.bf16 %v2132_v4, %v2131_v3  ;;  %v2404_v58 = vld [vmem:[%s5685_s13 + $0x20] sm:$0xff]  ;;  %v2739_v4 = vld [vmem:[%s5687_s15 + $0x18] sm:$0xff] }
 0x258   : > { %4284 = vmatpush3.bf16.msra.mxu0 %v4281_v0  ;;  %v3054_v0 = vld [vmem:[%s5683_s11 + $0x80] sm:$0xff] }
 0x259   : > { %4312 = vmatpush3.bf16.msra.mxu1 %v4309_v1  ;;  %4286 = vmatprep.subr.bf16.mxu0 %v4285_v7  ;;  %v3055_v1 = vld [vmem:[%s5683_s11 + $0x88] sm:$0xff] }
 0x25a   : > { %4314 = vmatprep.subr.bf16.mxu1 %v4313_v8  ;;  %v4348_v2 = vpack.c.bf16 %v3055_v1, %v3054_v0  ;;  %v2736_v0 = vld [vmem:[%s5687_s15] sm:$0xff]  ;;  %v2737_v1 = vld [vmem:[%s5687_s15 + $0x8] sm:$0xff] }
 0x25b   : > { %v4444_v3 = vpack.c.bf16 %v2737_v1, %v2736_v0  ;;  %v2398_v0 = vld [vmem:[%s5686_s14] sm:$0x1] }
 0x25c   : > { %4288 = vmatpush3.bf16.msra.mxu0 %v4285_v7  ;;  %v3057_v7 = vld [vmem:[%s5683_s11 + $0x98] sm:$0xff] }
 0x25d   : > { %4316 = vmatpush3.bf16.msra.mxu1 %v4313_v8  ;;  %4290 = vmatprep.subr.bf16.mxu0 %v4289_v13  ;;  %v4351_v8 = vpack.c.bf16 %v3057_v7, %v3056_v6  ;;  %v2740_v6 = vld [vmem:[%s5687_s15 + $0x20] sm:$0xff]  ;;  %v2741_v7 = vld [vmem:[%s5687_s15 + $0x28] sm:$0xff] }
 0x25e   : > { %4318 = vmatprep.subr.bf16.mxu1 %v4317_v14 }
 0x260   : > { %4292 = vmatpush3.bf16.msra.mxu0 %v4289_v13  ;;  %v3059_v13 = vld [vmem:[%s5683_s11 + $0xa8] sm:$0xff] }
 0x261   : > { %4320 = vmatpush3.bf16.msra.mxu1 %v4317_v14  ;;  %4294 = vmatprep.subr.bf16.mxu0 %v4293_v19  ;;  %v4354_v14 = vpack.c.bf16 %v3059_v13, %v3058_v12 }
 0x262   : > { %4322 = vmatprep.subr.bf16.mxu1 %v4321_v20 }
 0x264   : > { %4296 = vmatpush3.bf16.msra.mxu0 %v4293_v19  ;;  %v3061_v19 = vld [vmem:[%s5683_s11 + $0xb8] sm:$0xff] }
 0x265   : > { %4324 = vmatpush3.bf16.msra.mxu1 %v4321_v20  ;;  %4298 = vmatprep.subr.bf16.mxu0 %v4297_v25  ;;  %v2137_v20 = vld [vmem:[%s5683_s11 + $0x50] sm:$0xff]  ;;  %v4357_v21 = vpack.c.bf16 %v3061_v19, %v3060_v18 }
 0x266   : > { %4326 = vmatprep.subr.bf16.mxu1 %v4325_v26  ;;  %v4375_v23 = vpack.c.bf16 %v2138_v22, %v2137_v20  ;;  %v3079_v20 = vld [vmem:[%s5685_s13 + $0x40] sm:$0xff] }
 0x268   : > { %4300 = vmatpush3.bf16.msra.mxu0 %v4297_v25 }
 0x269   : > { %4328 = vmatpush3.bf16.msra.mxu1 %v4325_v26  ;;  %4302 = vmatprep.subr.bf16.mxu0 %v4301_v31 }
 0x26a   : > { %4330 = vmatprep.subr.bf16.mxu1 %v4329_v32 }
 0x26c   : > { %4304 = vmatpush3.bf16.msra.mxu0 %v4301_v31  ;;  %v4378_v31 = vpack.c.bf16 %v3065_v30, %v3064_v29  ;;  %v3085_v30 = vld [vmem:[%s5685_s13 + $0x70] sm:$0xff] }
 0x26d   : > { %4332 = vmatpush3.bf16.msra.mxu1 %v4329_v32  ;;  %3773 = vmatprep.subr.mxu0 %v3025_v33  ;;  %v3066_v32 = vld [vmem:[%s5683_s11 + $0xd0] sm:$0xff] }
 0x26e   : > { %3806 = vmatprep.subr.mxu1 %v3042_v34 }
 0x270   : > { %3774 = vmatpush3.msra.mxu0 %v3025_v33  ;;  %v3067_v33 = vld [vmem:[%s5683_s11 + $0xd8] sm:$0xff] }
 0x271   : > { %3807 = vmatpush3.msra.mxu1 %v3042_v34  ;;  %3776 = vmatmul.mubr.msk.f32.vlgmr.msra.gmra.mrb[8].mxu0 %vm1381_vm6, %v1764_v35  ;;  %v4381_v38 = vpack.c.bf16 %v3067_v33, %v3066_v32  ;;  %v3088_v33 = vld [vmem:[%s5685_s13 + $0x80] sm:$0xff] }
 0x272   : > { %3809 = vmatmul.mubr.msk.f32.vlgmr.msra.gmra.mrb[4].mxu1 %vm1381_vm6, %v1764_v35  ;;  %4333 = vmatprep.subr.bf16.mxu0 %v4594_v36 }
 0x273   : > { %4359 = vmatprep.subr.bf16.mxu1 %v4594_v36  ;;  %3815 = vmatprep.mubr.msk.f32.mxu0 %vm4595_vm7, %v4596_v37 }
 0x274   : > { %3876 = vmatprep.mubr.msk.f32.mxu1 %vm4595_vm7, %v4596_v37  ;;  %4361 = vmatpush3.bf16.msra.mxu1 %v4360_v40  ;;  %v3069_v40 = vld [vmem:[%s5683_s11 + $0xe8] sm:$0xff] }
 0x275   : > { %4362 = vmatprep.subr.bf16.mxu1 %v4594_v36  ;;  %v4384_v41 = vpack.c.bf16 %v3069_v40, %v3068_v39  ;;  %v3091_v39 = vld [vmem:[%s5685_s13 + $0x98] sm:$0xff] }
 0x278   : > { %4364 = vmatpush3.bf16.msra.mxu1 %v4363_v43  ;;  %v3071_v43 = vld [vmem:[%s5683_s11 + $0xf8] sm:$0xff] }
 0x279   : > { %4365 = vmatprep.subr.bf16.mxu1 %v4594_v36 }
 0x27c   : > { %4367 = vmatpush3.bf16.msra.mxu1 %v4366_v5 }
 0x27d   : > { %4368 = vmatprep.subr.bf16.mxu1 %v4594_v36 }
 0x280   : > { %4370 = vmatpush3.bf16.msra.mxu1 %v4369_v11 }
 0x281   : > { %4371 = vmatprep.subr.bf16.mxu1 %v4594_v36 }
 0x284   : > { %4373 = vmatpush3.bf16.msra.mxu1 %v4372_v17 }
 0x285   : > { %4374 = vmatprep.subr.bf16.mxu1 %v4594_v36 }
 0x288   : > { %4376 = vmatpush3.bf16.msra.mxu1 %v4375_v23  ;;  %v3081_v23 = vld [vmem:[%s5685_s13 + $0x50] sm:$0xff] }
 0x289   : > { %4395 = vmatprep.subr.bf16.mxu1 %v4594_v36 }
 0x344   : > { %v3777_v44 = vpop.f32.mrb[8].mxu0 }
 0x345   : > { %v3810_v45 = vpop.f32.mrb[4].mxu1  ;;  %v1853_v47 = vpop.f32.mrb[9].mxu0 }
 0x346   : > { %v1958_v48 = vmax.f32 %v3777_v44, %v3810_v45  ;;  %v1946_v49 = vpop.f32.mrb[5].mxu1  ;;  %v4387_v44 = vpack.c.bf16 %v3071_v43, %v3070_v42  ;;  %v3072_v45 = vld [vmem:[%s5683_s11 + $0x100] sm:$0xff]  ;;  %v3093_v43 = vld [vmem:[%s5685_s13 + $0xa8] sm:$0xff] }
 0x347   : > { %v1957_v50 = vmax.f32 %v1853_v47, %v1946_v49  ;;  %v3075_v49 = vld [vmem:[%s5683_s11 + $0x118] sm:$0xff]  ;;  %v3092_v42 = vld [vmem:[%s5685_s13 + $0xa0] sm:$0xff] }
 0x348   : > { %v1967_v51 = vadd.f32 %v3045_v46, %v1958_v48  ;;  %v3074_v48 = vld [vmem:[%s5683_s11 + $0x110] sm:$0xff] }
 0x349   : > { %v1966_v52 = vadd.f32 %v3045_v46, %v1957_v50  ;;  %v3073_v46 = vld [vmem:[%s5683_s11 + $0x108] sm:$0xff]  ;;  %v4393_v50 = vpack.c.bf16 %v3075_v49, %v3074_v48  ;;  %v3097_v48 = vld [vmem:[%s5685_s13 + $0xc0] sm:$0xff] }
 0x34a   : > { %v1969_v53 = vmax.f32 %v1967_v51, 0.0  ;;  %v4390_v47 = vpack.c.bf16 %v3073_v46, %v3072_v45  ;;  %v3094_v45 = vld [vmem:[%s5685_s13 + $0xb0] sm:$0xff]  ;;  %v3095_v46 = vld [vmem:[%s5685_s13 + $0xb8] sm:$0xff]  ;;  %v3098_v49 = vld [vmem:[%s5685_s13 + $0xc8] sm:$0xff] }
 0x34b   : > { %v1968_v54 = vmax.f32 %v1966_v52, 0.0  ;;  %v2400_v52 = vld [vmem:[%s5685_s13] sm:$0xff] }
 0x34d   : > { %v4334_v55 = vpack.c.bf16 %v1969_v53, %v1968_v54  ;;  %v2401_v53 = vld [vmem:[%s5685_s13 + $0x8] sm:$0xff] }
 0x34e   : > { %v4396_v54 = vpack.c.bf16 %v2401_v53, %v2400_v52  ;;  %v3100_v52 = vld [vmem:[%s5685_s13 + $0xd8] sm:$0xff] }
 0x34f   : > { %4336 = vmatpush3.bf16.msk.msra.mxu0 %vm4335_vm9, %v4334_v55 }
 0x350   : > { %4337 = vmatprep.subr.bf16.mxu0 %v4594_v36 }
 0x352   : > { %3816 = vmatmul.mubr.msk.f32.vlgmr.msra.gmra.mrb[10].mxu0 %vm1971_vm10, %v1970_v56  ;;  %v2403_v56 = vld [vmem:[%s5685_s13 + $0x18] sm:$0xff] }
 0x353   : > { %4340 = vmatpush3.bf16.msk.msra.mxu0 %vm4335_vm9, %v4334_v55  ;;  %3822 = vmatprep.mubr.msk.f32.mxu0 %vm4595_vm7, %v4596_v37  ;;  %v2402_v55 = vld [vmem:[%s5685_s13 + $0x10] sm:$0xff] }
 0x354   : > { %4341 = vmatprep.subr.bf16.mxu0 %v4594_v36  ;;  %v4399_v57 = vpack.c.bf16 %v2403_v56, %v2402_v55  ;;  %v3101_v55 = vld [vmem:[%s5685_s13 + $0xe0] sm:$0xff]  ;;  %v3102_v56 = vld [vmem:[%s5685_s13 + $0xe8] sm:$0xff] }
 0x356   : > { %3823 = vmatmul.mubr.msk.f32.vlgmr.msra.gmra.mrb[12].mxu0 %vm1971_vm10, %v2049_v59  ;;  %v2405_v59 = vld [vmem:[%s5685_s13 + $0x28] sm:$0xff] }
 0x357   : > { %4343 = vmatpush3.bf16.msra.mxu0 %v4342_v60  ;;  %3849 = vmatprep.mubr.msk.f32.mxu0 %vm4595_vm7, %v4596_v37  ;;  %v4402_v60 = vpack.c.bf16 %v2405_v59, %v2404_v58  ;;  %v3103_v58 = vld [vmem:[%s5685_s13 + $0xf0] sm:$0xff] }
 0x358   : > { %4344 = vmatprep.subr.bf16.mxu0 %v4594_v36 }
 0x35b   : > { %4346 = vmatpush3.bf16.msra.mxu0 %v4345_v63  ;;  %v4405_v63 = vpack.c.bf16 %v2407_v62, %v2406_v61  ;;  %v2742_v61 = vld [vmem:[%s5687_s15 + $0x30] sm:$0xff]  ;;  %v2743_v62 = vld [vmem:[%s5687_s15 + $0x38] sm:$0xff] }
 0x35c   : > { %4347 = vmatprep.subr.bf16.mxu0 %v4594_v36 }
 0x35f   : > { %4349 = vmatpush3.bf16.msra.mxu0 %v4348_v2  ;;  %v2738_v2 = vld [vmem:[%s5687_s15 + $0x10] sm:$0xff] }
 0x360   : > { %4350 = vmatprep.subr.bf16.mxu0 %v4594_v36  ;;  %v4447_v5 = vpack.c.bf16 %v2739_v4, %v2738_v2  ;;  %v2744_v4 = vld [vmem:[%s5714_s22] sm:$0x1] }
 0x363   : > { %4352 = vmatpush3.bf16.msra.mxu0 %v4351_v8  ;;  %v4450_v8 = vpack.c.bf16 %v2741_v7, %v2740_v6 }
 0x364   : > { %4353 = vmatprep.subr.bf16.mxu0 %v4594_v36 }
 0x367   : > { %4355 = vmatpush3.bf16.msra.mxu0 %v4354_v14 }
 0x368   : > { %4356 = vmatprep.subr.bf16.mxu0 %v4594_v36 }
 0x36b   : > { %4358 = vmatpush3.bf16.msra.mxu0 %v4357_v21  ;;  %v3080_v21 = vld [vmem:[%s5685_s13 + $0x48] sm:$0xff] }
 0x36c   : > { %4377 = vmatprep.subr.bf16.mxu0 %v4594_v36  ;;  %v4408_v22 = vpack.c.bf16 %v3080_v21, %v3079_v20 }
 0x425   : > { %v2045_v24 = vpop.f32.mrb[10].mxu0 }
 0x426   : > { %v3817_v25 = vpop.f32.mrb[11].mxu0 }
 0x429   : > { %v2119_v26 = vpop.f32.mrb[12].mxu0 }
 0x42a   : > { %v2123_v27 = vmax.f32 %v2045_v24, %v2119_v26  ;;  %v3824_v28 = vpop.f32.mrb[13].mxu0  ;;  %v3082_v24 = vld [vmem:[%s5685_s13 + $0x58] sm:$0xff] }
 0x42b   : > { %v4411_v26 = vpack.c.bf16 %v3082_v24, %v3081_v23  ;;  %v3084_v28 = vld [vmem:[%s5685_s13 + $0x68] sm:$0xff] }
 0x42c   : > { %2125 = vst.msk [vmem:[#allocation3] sm:$0x3f] %vm2124_vm11, %v2123_v27  ;;  %v3083_v27 = vld [vmem:[%s5685_s13 + $0x60] sm:$0xff] }
 0x42d   : > { %v4414_v29 = vpack.c.bf16 %v3084_v28, %v3083_v27 }
 0x433   : > { %v2139_v34 = vld [vmem:[#allocation3 + $0x1] sm:$0xf] }
 0x434   : > { %v2126_v35 = vld [vmem:[#allocation3] sm:$0xf]  ;;  %3850 = vmatmul.mubr.msk.f32.vlgmr.msra.gmra.mrb[14].mxu0 %vm591_vm0, %v2139_v34  ;;  %v3089_v34 = vld [vmem:[%s5685_s13 + $0x88] sm:$0xff] }
 0x435   : > { %3877 = vmatmul.mubr.msk.f32.vlgmr.msra.gmra.mrb[6].mxu1 %vm591_vm0, %v2126_v35  ;;  %4379 = vmatpush3.bf16.msra.mxu0 %v4378_v31  ;;  %v2299_v51 = vld [vmem:[#allocation3 + $0x2] sm:$0xf]  ;;  %v3086_v31 = vld [vmem:[%s5685_s13 + $0x78] sm:$0xff]  ;;  %v4420_v35 = vpack.c.bf16 %v3089_v34, %v3088_v33 }
 0x436   : > { %3903 = vmatprep.mubr.msk.f32.mxu0 %vm4595_vm7, %v4596_v37  ;;  %4380 = vmatprep.subr.bf16.mxu0 %v4594_v36  ;;  %v4417_v32 = vpack.c.bf16 %v3086_v31, %v3085_v30 }
 0x437   : > { %3922 = vmatprep.mubr.msk.f32.mxu1 %vm4595_vm7, %v4596_v37  ;;  %4397 = vmatpush3.bf16.msra.mxu1 %v4396_v54 }
 0x438   : > { %4398 = vmatprep.subr.bf16.mxu1 %v4594_v36 }
 0x439   : > { %4382 = vmatpush3.bf16.msra.mxu0 %v4381_v38  ;;  %v3090_v38 = vld [vmem:[%s5685_s13 + $0x90] sm:$0xff] }
 0x43a   : > { %4383 = vmatprep.subr.bf16.mxu0 %v4594_v36 }
 0x43b   : > { %4400 = vmatpush3.bf16.msra.mxu1 %v4399_v57  ;;  %v4438_v57 = vpack.c.bf16 %v3102_v56, %v3101_v55 }
 0x43c   : > { %4401 = vmatprep.subr.bf16.mxu1 %v4594_v36 }
 0x43d   : > { %4385 = vmatpush3.bf16.msra.mxu0 %v4384_v41  ;;  %v4423_v41 = vpack.c.bf16 %v3091_v39, %v3090_v38 }
 0x43e   : > { %4386 = vmatprep.subr.bf16.mxu0 %v4594_v36 }
 0x43f   : > { %4403 = vmatpush3.bf16.msra.mxu1 %v4402_v60 }
 0x440   : > { %4404 = vmatprep.subr.bf16.mxu1 %v4594_v36 }
 0x441   : > { %4388 = vmatpush3.bf16.msra.mxu0 %v4387_v44  ;;  %v4426_v44 = vpack.c.bf16 %v3093_v43, %v3092_v42 }
 0x442   : > { %4389 = vmatprep.subr.bf16.mxu0 %v4594_v36 }
 0x443   : > { %4406 = vmatpush3.bf16.msra.mxu1 %v4405_v63  ;;  %v4453_v63 = vpack.c.bf16 %v2743_v62, %v2742_v61 }
 0x444   : > { %4407 = vmatprep.subr.bf16.mxu1 %v4594_v36 }
 0x445   : > { %4391 = vmatpush3.bf16.msra.mxu0 %v4390_v47  ;;  %v4429_v47 = vpack.c.bf16 %v3095_v46, %v3094_v45 }
 0x446   : > { %4392 = vmatprep.subr.bf16.mxu0 %v4594_v36 }
 0x449   : > { %4394 = vmatpush3.bf16.msra.mxu0 %v4393_v50  ;;  %v4432_v50 = vpack.c.bf16 %v3098_v49, %v3097_v48 }
 0x44a   : > { %4443 = vmatprep.subr.bf16.mxu0 %v4594_v36 }
 0x44c   : > { %3904 = vmatmul.mubr.msk.f32.vlgmr.msra.gmra.mrb[16].mxu0 %vm591_vm0, %v2299_v51  ;;  %v3099_v51 = vld [vmem:[%s5685_s13 + $0xd0] sm:$0xff] }
 0x44d   : > { %3998 = vmatprep.mubr.msk.f32.mxu0 %vm4595_vm7, %v4596_v37  ;;  %4445 = vmatpush3.bf16.msra.mxu0 %v4444_v3  ;;  %v4435_v54 = vpack.c.bf16 %v3100_v52, %v3099_v51 }
 0x44e   : > { %4446 = vmatprep.subr.bf16.mxu0 %v4594_v36 }
 0x451   : > { %4448 = vmatpush3.bf16.msra.mxu0 %v4447_v5 }
 0x452   : > { %4449 = vmatprep.subr.bf16.mxu0 %v4594_v36 }
 0x455   : > { %4451 = vmatpush3.bf16.msra.mxu0 %v4450_v8 }
 0x456   : > { %4452 = vmatprep.subr.bf16.mxu0 %v4594_v36 }
 0x459   : > { %4454 = vmatpush3.bf16.msra.mxu0 %v4453_v63 }
 0x507   : > { %v2222_v9 = vpop.f32.mrb[14].mxu0 }
 0x508   : > { %v2295_v10 = vpop.f32.mrb[6].mxu1  ;;  %v3851_v12 = vpop.f32.mrb[15].mxu0 }
 0x509   : > { %v2296_v11 = vadd.f32 %v2295_v10, %v2222_v9  ;;  %v3878_v13 = vpop.f32.mrb[7].mxu1 }
 0x51f   : > { %v2382_v14 = vpop.f32.mrb[16].mxu0 }
 0x520   : > { %v2386_v16 = vadd.f32 %v2382_v14, %v2296_v11  ;;  %v3905_v17 = vpop.f32.mrb[17].mxu0 }
 0x522   : > { %v2394_v18 = vadd.f32 %v3077_v15, %v2386_v16 }
 0x524   : > { %v2395_v19 = vmax.f32 %v2394_v18, 0.0 }
 0x526   : > { %2397 = vst.msk [vmem:[#allocation4] sm:$0xf] %vm2396_vm12, %v2395_v19 }
 0x52d   : > { %v2399_v25 = vld [vmem:[#allocation4] sm:$0x1]  ;;  %v2483_v40 = vld [vmem:[#allocation4 + $0x1] sm:$0x1]  ;;  %v2567_v53 = vld [vmem:[#allocation4 + $0x2] sm:$0x1] }
 0x52e   : > { %3923 = vmatmul.mubr.msk.f32.vlgmr.msra.gmra.mrb[8].mxu1 %vm2408_vm13, %v2399_v25  ;;  %v2651_v60 = vld [vmem:[#allocation4 + $0x3] sm:$0x1] }
 0x52f   : > { %4409 = vmatpush3.bf16.msra.mxu1 %v4408_v22  ;;  %3941 = vmatprep.mubr.msk.f32.mxu1 %vm4595_vm7, %v4596_v37 }
 0x530   : > { %4410 = vmatprep.subr.bf16.mxu1 %v4594_v36 }
 0x533   : > { %4412 = vmatpush3.bf16.msra.mxu1 %v4411_v26 }
 0x534   : > { %4413 = vmatprep.subr.bf16.mxu1 %v4594_v36 }
 0x537   : > { %4415 = vmatpush3.bf16.msra.mxu1 %v4414_v29 }
 0x538   : > { %4416 = vmatprep.subr.bf16.mxu1 %v4594_v36 }
 0x53b   : > { %4418 = vmatpush3.bf16.msra.mxu1 %v4417_v32 }
 0x53c   : > { %4419 = vmatprep.subr.bf16.mxu1 %v4594_v36 }
 0x53e   : > { %3942 = vmatmul.mubr.msk.f32.vlgmr.msra.gmra.mrb[8].mxu1 %vm2408_vm13, %v2483_v40 }
 0x53f   : > { %4421 = vmatpush3.bf16.msra.mxu1 %v4420_v35  ;;  %3960 = vmatprep.mubr.msk.f32.mxu1 %vm4595_vm7, %v4596_v37 }
 0x540   : > { %4422 = vmatprep.subr.bf16.mxu1 %v4594_v36 }
 0x543   : > { %4424 = vmatpush3.bf16.msra.mxu1 %v4423_v41 }
 0x544   : > { %4425 = vmatprep.subr.bf16.mxu1 %v4594_v36 }
 0x547   : > { %4427 = vmatpush3.bf16.msra.mxu1 %v4426_v44 }
 0x548   : > { %4428 = vmatprep.subr.bf16.mxu1 %v4594_v36 }
 0x54b   : > { %4430 = vmatpush3.bf16.msra.mxu1 %v4429_v47 }
 0x54c   : > { %4431 = vmatprep.subr.bf16.mxu1 %v4594_v36 }
 0x54e   : > { %3961 = vmatmul.mubr.msk.f32.vlgmr.msra.gmra.mrb[8].mxu1 %vm2408_vm13, %v2567_v53 }
 0x54f   : > { %4433 = vmatpush3.bf16.msra.mxu1 %v4432_v50  ;;  %3979 = vmatprep.mubr.msk.f32.mxu1 %vm4595_vm7, %v4596_v37  ;;  %v3104_v37 = vld [vmem:[%s5685_s13 + $0xf8] sm:$0xff] }
 0x550   : > { %4434 = vmatprep.subr.bf16.mxu1 %v4594_v36  ;;  %v4441_v59 = vpack.c.bf16 %v3104_v37, %v3103_v58 }
 0x553   : > { %4436 = vmatpush3.bf16.msra.mxu1 %v4435_v54 }
 0x554   : > { %4437 = vmatprep.subr.bf16.mxu1 %v4594_v36 }
 0x557   : > { %4439 = vmatpush3.bf16.msra.mxu1 %v4438_v57 }
 0x558   : > { %4440 = vmatprep.subr.bf16.mxu1 %v4594_v36 }
 0x55b   : > { %4442 = vmatpush3.bf16.msra.mxu1 %v4441_v59 }
 0x55e   : > { %3980 = vmatmul.mubr.msk.f32.vlgmr.msra.gmra.mrb[8].mxu1 %vm2408_vm13, %v2651_v60 }
 0x631   : > { %v2730_v36 = vpop.f32.mrb[8].mxu1 }
 0x632   : > { %v4455_v1 = vadd.f32 %v2730_v36, %v2398_v0  ;;  %v3981_v2 = vpop.f32.mrb[9].mxu1 }
 0x634   : > { %v2735_v3 = vmax.f32 %v4455_v1, 0.0 }
 0x636   : > { %3999 = vmatmul.mubr.msk.f32.vlgmr.msra.gmra.mrb[18].mxu0 %vm2408_vm13, %v2735_v3 }
 0x709   : > { %v2814_v5 = vpop.f32.mrb[18].mxu0 }
 0x70a   : > { %v2815_v6 = vadd.f32 %v2814_v5, %v2744_v4  ;;  %v4000_v7 = vpop.f32.mrb[19].mxu0 }
 0x70c   : > { %2819 = vst.msk [vmem:[%s540_s17] sm:$0x1] %vm2818_vm14, %v2815_v6 }
 0x70d   : > { %4542 = shalt.err (!%p4539_p3)
}
 0x70e   : > { %s4543_s27 = scalar_lea.hbm %s5630_s26, 16  ;;  %s4547_s17 = scalar_lea.hbm %s5715_s18, 32 }
 0x70f   : > { %p4544_p4 = scmp.ne.s32.totalorder %s5630_s26, %s4543_s27  ;;  %p4548_p9 = scmp.lt.u32.totalorder %s5630_s26, %s5715_s18 }
 0x710   : > { %p4549_p10 = scmp.lt.u32.totalorder %s4547_s17, %s4543_s27  ;;  %p4551_p12 = scmp.lt.u32.totalorder %s4543_s27, %s5630_s26 }
 0x711   : > { %p4545_p7 = pnand %p4544_p4, %p4726_p5 }
 0x712   : > { %p4550_p11 = por %p4549_p10, %p4548_p9 }
 0x713   : > { %p4546_p8 = pneg %p4545_p7 }
 0x714   : > { %p4552_p13 = por %p4551_p12, %p4550_p11 }
 0x716   : > { %p4553_p0 = pnand %p4552_p13, %p4546_p8 }
 0x718   : > { %4556 = shalt.err (!%p4553_p0)
}
 0x719   : > { %4486 = dma.vmem_to_hbm [thread:$0]  (%p4726_p5), %s5632_s29, 16, %s5630_s26, %s2821_s0  }
 0x71a PF: > { %s5716_s16 = sld [smem:[#allocation10_spill]]  ;;  %s5717_s28 = sld [smem:[#allocation8_spill]] }
 0x720   : > { %p4492_p1 = scmp.ge.s32.totalorder %s5716_s16, 2  ;;  %s2845_s21 = sand.u32 1, %s5717_s28  }
 0x721   : > { %s2846_s22 = scalar_lea.sflag [#allocation6], %s2845_s21 }
 0x722   : > { %p4489_p2 = pnand %p4492_p1, %p4730_p6 }
 0x724   : > { %4574 = dma.done.wait (!%p4489_p2), %s2846_s22, 16  }
 0x725   : > { %4576 = vsyncadd (!%p4489_p2), %s2846_s22, 4294967280  ;;  %s5719_s27 = sld [smem:[#allocation11_spill]]  ;;  %s5720_s17 = sld [smem:[#allocation9_spill]] }
 0x726   : > { %s5721_s26 = sld [smem:[#allocation12_spill]]  ;;  %s5722_s24 = smov %s4583_s25 }
 0x72b   : > { %p27_p3 = scmp.ge.s32.totalorder %s5719_s27, 4   ;;  %s5723_s25 = smov %s5720_s17 }
 0x72d   :  { %29 = sbr.rel (!%p27_p3) target bundleno = 8 (0x8), region = 136 }
 0x734   :  { %2850 = vsyncpa [#allocation6], 1 }
 0x735   :  { %2852 = vsyncpa [#allocation6 + $0x1], 1 }

</bundles_post_ra>
